<compile_context>
chip_gen: v5e
topology: v5e:2x2
jax: 0.10.0
libtpu: 0.0.40
codegen_flags: <defaults>
</compile_context>

<pallas_src>
import jax
import jax.numpy as jnp
from jax.experimental import pallas as pl
from jax.experimental.pallas import tpu as pltpu


def mlp_kernel(x_ref,
               w1_ref, b1_ref,
               w2_ref, b2_ref,
               w3_ref, b3_ref,
               w4_ref, b4_ref,
               o_ref):
    """Fused: Linear -> ReLU -> Linear -> ReLU -> Linear -> ReLU -> Linear.

    Weights arrive pre-cast to bf16 (MXU dtype); matmuls accumulate in f32.
    The elementwise (bias + ReLU) dtype for hidden layers follows the bias dtype
    (bf16 on v6e/v7x, f32 on v5e); the final bias-add is always f32.
    """
    act_dtype = b1_ref.dtype

    x = x_ref[...].astype(jnp.bfloat16)

    h = jnp.dot(x, w1_ref[...], preferred_element_type=jnp.float32)
    h = jnp.maximum(h.astype(act_dtype) + b1_ref[...], 0).astype(jnp.bfloat16)

    h = jnp.dot(h, w2_ref[...], preferred_element_type=jnp.float32)
    h = jnp.maximum(h.astype(act_dtype) + b2_ref[...], 0).astype(jnp.bfloat16)

    h = jnp.dot(h, w3_ref[...], preferred_element_type=jnp.float32)
    h = jnp.maximum(h.astype(act_dtype) + b3_ref[...], 0).astype(jnp.bfloat16)

    out = jnp.dot(h, w4_ref[...], preferred_element_type=jnp.float32) + b4_ref[...]
    o_ref[...] = out.astype(o_ref.dtype)


def _elementwise_bf16_default():
    """bf16 VPU elementwise only on v6e/v7x; v5e (and unknown) stay f32."""
    try:
        kind = jax.devices()[0].device_kind.lower()
    except Exception:
        return False
    return ("v6" in kind) or ("v7" in kind)


def prepare_mlp_params(params, *, elementwise_bf16=None):
    """One-time weight prep (hoisted out of the per-call path).

    Returns [(W_bf16 (in,out), b (1,out))]; hidden-layer biases are bf16 on
    chips with a bf16 VPU, final bias stays f32.
    """
    if elementwise_bf16 is None:
        elementwise_bf16 = _elementwise_bf16_default()
    act_dtype = jnp.bfloat16 if elementwise_bf16 else jnp.float32
    n = len(params)
    prepared = []
    for i, (w, b) in enumerate(params):
        wb = jnp.asarray(w, jnp.bfloat16)
        b_dtype = jnp.float32 if i == n - 1 else act_dtype
        bb = jnp.asarray(b, b_dtype).reshape(1, -1)
        prepared.append((wb, bb))
    return prepared


def _pick_batch_tile(B):
    """Amortize ~0.35us/step grid overhead, but keep >=2 steps for v7x megacore."""
    B_pad128 = pl.cdiv(B, 128) * 128
    if B_pad128 <= 128:
        return 128
    half = (B_pad128 // 2 // 128) * 128
    return max(128, min(512, half))


def mlp_forward(x, prepared_params, *, batch_tile=None):
    """x: (B, input_dim) f32. prepared_params: output of prepare_mlp_params()."""
    (w1, b1), (w2, b2), (w3, b3), (w4, b4) = prepared_params
    B, in_dim = x.shape
    hidden = w1.shape[1]
    out_dim = w4.shape[1]

    TB = batch_tile if batch_tile is not None else _pick_batch_tile(B)
    B_pad = pl.cdiv(B, TB) * TB
    x_pad = x if B_pad == B else jnp.pad(x, ((0, B_pad - B), (0, 0)))

    grid = (B_pad // TB,)
    const = lambda i: (0, 0)   # weights/biases: same block every step -> resident in VMEM

    in_specs = [
        pl.BlockSpec((TB, in_dim), lambda i: (i, 0)),
        pl.BlockSpec(w1.shape, const), pl.BlockSpec(b1.shape, const),
        pl.BlockSpec(w2.shape, const), pl.BlockSpec(b2.shape, const),
        pl.BlockSpec(w3.shape, const), pl.BlockSpec(b3.shape, const),
        pl.BlockSpec(w4.shape, const), pl.BlockSpec(b4.shape, const),
    ]
    # Unpadded output block: last dim == full array dim (legal); 16x fewer write
    # bytes than padding out to 128 lanes, and no wrapper column slice.
    out_specs = pl.BlockSpec((TB, out_dim), lambda i: (i, 0))

    flops = 2 * B_pad * (in_dim * hidden + 2 * hidden * hidden + hidden * out_dim)
    bytes_accessed = (
        x_pad.size * 4
        + sum(w.size * w.dtype.itemsize for (w, _) in prepared_params)
        + sum(b.size * b.dtype.itemsize for (_, b) in prepared_params)
        + B_pad * out_dim * 4
    )

    out = pl.pallas_call(
        mlp_kernel,
        out_shape=jax.ShapeDtypeStruct((B_pad, out_dim), jnp.float32),
        grid=grid,
        in_specs=in_specs,
        out_specs=out_specs,
        compiler_params=pltpu.CompilerParams(
            dimension_semantics=("parallel",),
        ),
        cost_estimate=pl.CostEstimate(
            flops=flops, transcendentals=0, bytes_accessed=bytes_accessed),
    )(x_pad, w1, b1, w2, b2, w3, b3, w4, b4)

    return out if B_pad == B else out[:B]


def init_mlp_params(key, input_dim, output_dim, hidden_size):
    """Deterministic init mimicking nn.Linear's Kaiming-uniform default (f32)."""
    dims = [(input_dim, hidden_size),
            (hidden_size, hidden_size),
            (hidden_size, hidden_size),
            (hidden_size, output_dim)]
    params = []
    for (fan_in, fan_out) in dims:
        key, kw, kb = jax.random.split(key, 3)
        bound = 1.0 / (fan_in ** 0.5)
        w = jax.random.uniform(kw, (fan_in, fan_out), jnp.float32, -bound, bound)
        b = jax.random.uniform(kb, (1, fan_out), jnp.float32, -bound, bound)
        params.append((w, b))
    return params


def mlp_reference(x, params):
    """Pure-JAX f32 reference (matches the PyTorch module's forward)."""
    h = x
    for i, (w, b) in enumerate(params):
        h = h @ w + b
        if i < len(params) - 1:
            h = jnp.maximum(h, 0.0)
    return h


if __name__ == "__main__":
    key = jax.random.PRNGKey(0)
    k_x, k_p = jax.random.split(key)

    batch = 256          # multiple batch tiles -> exercises the grid (2 steps)
    input_dim = 16
    output_dim = 8
    hidden_size = 256    # PyTorch default

    x = jax.random.normal(k_x, (batch, input_dim), dtype=jnp.float32)
    params = init_mlp_params(k_p, input_dim, output_dim, hidden_size)

    # One-time weight prep (bf16 cast), hoisted out of the forward call.
    prepared = prepare_mlp_params(params)
    prepared = jax.block_until_ready(prepared)

    out = mlp_forward(x, prepared)
    out = jax.block_until_ready(out)

    ref = mlp_reference(x, params)
    assert out.shape == (batch, output_dim), out.shape
    # bf16 matmul operands with f32 accumulation -> loosened tolerance vs f32 ref.
    assert jnp.allclose(out, ref, atol=5e-2, rtol=5e-2), (
        "mismatch vs reference, max abs diff = %f" % float(jnp.max(jnp.abs(out - ref))))

    print("KERNEL_OK")
</pallas_src>

<mosaic_0001>
module attributes {stable_mosaic.version = 11 : i64} {
  func.func @mlp_kernel(%arg0: i32, %arg1: memref<128x16xf32, #tpu.memory_space<vmem>>, %arg2: memref<16x256xbf16, #tpu.memory_space<vmem>>, %arg3: memref<1x256xf32, #tpu.memory_space<vmem>>, %arg4: memref<256x256xbf16, #tpu.memory_space<vmem>>, %arg5: memref<1x256xf32, #tpu.memory_space<vmem>>, %arg6: memref<256x256xbf16, #tpu.memory_space<vmem>>, %arg7: memref<1x256xf32, #tpu.memory_space<vmem>>, %arg8: memref<256x8xbf16, #tpu.memory_space<vmem>>, %arg9: memref<1x8xf32, #tpu.memory_space<vmem>>, %arg10: memref<128x8xf32, #tpu.memory_space<vmem>>) attributes {dimension_semantics = [#tpu.dimension_semantics<parallel>], iteration_bounds = array<i64: 2>, scalar_prefetch = 0 : i64, scratch_operands = 0 : i64, tpu.core_type = #tpu.core_type<tc>, window_params = [{transform_indices = @transform_0, window_bounds = array<i64: 128, 16>}, {pipeline_mode = #tpu.pipeline_mode<synchronous>, transform_indices = @transform_1, window_bounds = array<i64: 16, 256>}, {pipeline_mode = #tpu.pipeline_mode<synchronous>, transform_indices = @transform_2, window_bounds = array<i64: 1, 256>}, {pipeline_mode = #tpu.pipeline_mode<synchronous>, transform_indices = @transform_3, window_bounds = array<i64: 256, 256>}, {pipeline_mode = #tpu.pipeline_mode<synchronous>, transform_indices = @transform_4, window_bounds = array<i64: 1, 256>}, {pipeline_mode = #tpu.pipeline_mode<synchronous>, transform_indices = @transform_5, window_bounds = array<i64: 256, 256>}, {pipeline_mode = #tpu.pipeline_mode<synchronous>, transform_indices = @transform_6, window_bounds = array<i64: 1, 256>}, {pipeline_mode = #tpu.pipeline_mode<synchronous>, transform_indices = @transform_7, window_bounds = array<i64: 256, 8>}, {pipeline_mode = #tpu.pipeline_mode<synchronous>, transform_indices = @transform_8, window_bounds = array<i64: 1, 8>}, {transform_indices = @transform_9, window_bounds = array<i64: 128, 8>}]} {
    %c0 = arith.constant 0 : index
    %c0_0 = arith.constant 0 : index
    %0 = vector.load %arg1[%c0, %c0_0] : memref<128x16xf32, #tpu.memory_space<vmem>>, vector<128x16xf32>
    %1 = arith.truncf %0 : vector<128x16xf32> to vector<128x16xbf16>
    %c0_1 = arith.constant 0 : index
    %c0_2 = arith.constant 0 : index
    %2 = vector.load %arg2[%c0_1, %c0_2] : memref<16x256xbf16, #tpu.memory_space<vmem>>, vector<16x256xbf16>
    %cst = arith.constant dense<0.000000e+00> : vector<128x256xf32>
    %3 = tpu.matmul %1, %2, %cst {dimension_numbers = #tpu.dot_dimension_numbers<[1], [0], [0], [1], [0, 0, 1, 1], [], []>} : vector<128x16xbf16>, vector<16x256xbf16>, vector<128x256xf32> -> vector<128x256xf32>
    %c0_3 = arith.constant 0 : index
    %c0_4 = arith.constant 0 : index
    %4 = vector.load %arg3[%c0_3, %c0_4] : memref<1x256xf32, #tpu.memory_space<vmem>>, vector<1x256xf32>
    %5 = vector.broadcast %4 : vector<1x256xf32> to vector<128x256xf32>
    %6 = arith.addf %3, %5 : vector<128x256xf32>
    %cst_5 = arith.constant 0.000000e+00 : f32
    %7 = vector.broadcast %cst_5 : f32 to vector<128x256xf32>
    %8 = arith.maximumf %6, %7 : vector<128x256xf32>
    %9 = arith.truncf %8 : vector<128x256xf32> to vector<128x256xbf16>
    %c0_6 = arith.constant 0 : index
    %c0_7 = arith.constant 0 : index
    %10 = vector.load %arg4[%c0_6, %c0_7] : memref<256x256xbf16, #tpu.memory_space<vmem>>, vector<256x256xbf16>
    %cst_8 = arith.constant dense<0.000000e+00> : vector<128x256xf32>
    %11 = tpu.matmul %9, %10, %cst_8 {dimension_numbers = #tpu.dot_dimension_numbers<[1], [0], [0], [1], [0, 0, 1, 1], [], []>} : vector<128x256xbf16>, vector<256x256xbf16>, vector<128x256xf32> -> vector<128x256xf32>
    %c0_9 = arith.constant 0 : index
    %c0_10 = arith.constant 0 : index
    %12 = vector.load %arg5[%c0_9, %c0_10] : memref<1x256xf32, #tpu.memory_space<vmem>>, vector<1x256xf32>
    %13 = vector.broadcast %12 : vector<1x256xf32> to vector<128x256xf32>
    %14 = arith.addf %11, %13 : vector<128x256xf32>
    %cst_11 = arith.constant 0.000000e+00 : f32
    %15 = vector.broadcast %cst_11 : f32 to vector<128x256xf32>
    %16 = arith.maximumf %14, %15 : vector<128x256xf32>
    %17 = arith.truncf %16 : vector<128x256xf32> to vector<128x256xbf16>
    %c0_12 = arith.constant 0 : index
    %c0_13 = arith.constant 0 : index
    %18 = vector.load %arg6[%c0_12, %c0_13] : memref<256x256xbf16, #tpu.memory_space<vmem>>, vector<256x256xbf16>
    %cst_14 = arith.constant dense<0.000000e+00> : vector<128x256xf32>
    %19 = tpu.matmul %17, %18, %cst_14 {dimension_numbers = #tpu.dot_dimension_numbers<[1], [0], [0], [1], [0, 0, 1, 1], [], []>} : vector<128x256xbf16>, vector<256x256xbf16>, vector<128x256xf32> -> vector<128x256xf32>
    %c0_15 = arith.constant 0 : index
    %c0_16 = arith.constant 0 : index
    %20 = vector.load %arg7[%c0_15, %c0_16] : memref<1x256xf32, #tpu.memory_space<vmem>>, vector<1x256xf32>
    %21 = vector.broadcast %20 : vector<1x256xf32> to vector<128x256xf32>
    %22 = arith.addf %19, %21 : vector<128x256xf32>
    %cst_17 = arith.constant 0.000000e+00 : f32
    %23 = vector.broadcast %cst_17 : f32 to vector<128x256xf32>
    %24 = arith.maximumf %22, %23 : vector<128x256xf32>
    %25 = arith.truncf %24 : vector<128x256xf32> to vector<128x256xbf16>
    %c0_18 = arith.constant 0 : index
    %c0_19 = arith.constant 0 : index
    %26 = vector.load %arg8[%c0_18, %c0_19] : memref<256x8xbf16, #tpu.memory_space<vmem>>, vector<256x8xbf16>
    %cst_20 = arith.constant dense<0.000000e+00> : vector<128x8xf32>
    %27 = tpu.matmul %25, %26, %cst_20 {dimension_numbers = #tpu.dot_dimension_numbers<[1], [0], [0], [1], [0, 0, 1, 1], [], []>} : vector<128x256xbf16>, vector<256x8xbf16>, vector<128x8xf32> -> vector<128x8xf32>
    %c0_21 = arith.constant 0 : index
    %c0_22 = arith.constant 0 : index
    %28 = vector.load %arg9[%c0_21, %c0_22] : memref<1x8xf32, #tpu.memory_space<vmem>>, vector<1x8xf32>
    %29 = vector.broadcast %28 : vector<1x8xf32> to vector<128x8xf32>
    %30 = arith.addf %27, %29 : vector<128x8xf32>
    %c0_23 = arith.constant 0 : index
    %c0_24 = arith.constant 0 : index
    %31 = vector.load %arg10[%c0_23, %c0_24] : memref<128x8xf32, #tpu.memory_space<vmem>>, vector<128x8xf32>
    tpu.vector_store %arg10[%c0_23, %c0_24], %30 {strides = array<i32>} : memref<128x8xf32, #tpu.memory_space<vmem>>, vector<128x8xf32>,
    return
  }
  func.func @transform_0(%arg0: i32) -> (i32, i32) {
    %c0_i32 = arith.constant 0 : i32
    %c0_i32_0 = arith.constant 0 : i32
    return %arg0, %c0_i32 : i32, i32
  }
  func.func @transform_1(%arg0: i32) -> (i32, i32) {
    %c0_i32 = arith.constant 0 : i32
    %c0_i32_0 = arith.constant 0 : i32
    %c0_i32_1 = arith.constant 0 : i32
    return %c0_i32, %c0_i32_0 : i32, i32
  }
  func.func @transform_2(%arg0: i32) -> (i32, i32) {
    %c0_i32 = arith.constant 0 : i32
    %c0_i32_0 = arith.constant 0 : i32
    %c0_i32_1 = arith.constant 0 : i32
    return %c0_i32, %c0_i32_0 : i32, i32
  }
  func.func @transform_3(%arg0: i32) -> (i32, i32) {
    %c0_i32 = arith.constant 0 : i32
    %c0_i32_0 = arith.constant 0 : i32
    %c0_i32_1 = arith.constant 0 : i32
    return %c0_i32, %c0_i32_0 : i32, i32
  }
  func.func @transform_4(%arg0: i32) -> (i32, i32) {
    %c0_i32 = arith.constant 0 : i32
    %c0_i32_0 = arith.constant 0 : i32
    %c0_i32_1 = arith.constant 0 : i32
    return %c0_i32, %c0_i32_0 : i32, i32
  }
  func.func @transform_5(%arg0: i32) -> (i32, i32) {
    %c0_i32 = arith.constant 0 : i32
    %c0_i32_0 = arith.constant 0 : i32
    %c0_i32_1 = arith.constant 0 : i32
    return %c0_i32, %c0_i32_0 : i32, i32
  }
  func.func @transform_6(%arg0: i32) -> (i32, i32) {
    %c0_i32 = arith.constant 0 : i32
    %c0_i32_0 = arith.constant 0 : i32
    %c0_i32_1 = arith.constant 0 : i32
    return %c0_i32, %c0_i32_0 : i32, i32
  }
  func.func @transform_7(%arg0: i32) -> (i32, i32) {
    %c0_i32 = arith.constant 0 : i32
    %c0_i32_0 = arith.constant 0 : i32
    %c0_i32_1 = arith.constant 0 : i32
    return %c0_i32, %c0_i32_0 : i32, i32
  }
  func.func @transform_8(%arg0: i32) -> (i32, i32) {
    %c0_i32 = arith.constant 0 : i32
    %c0_i32_0 = arith.constant 0 : i32
    %c0_i32_1 = arith.constant 0 : i32
    return %c0_i32, %c0_i32_0 : i32, i32
  }
  func.func @transform_9(%arg0: i32) -> (i32, i32) {
    %c0_i32 = arith.constant 0 : i32
    %c0_i32_0 = arith.constant 0 : i32
    return %arg0, %c0_i32 : i32, i32
  }
}

</mosaic_0001>

<bundles_post_ra>
// kernel: tpu_custom_call.1
= control target key start
LH: loop header
LB: loop body
LE: loop exit
PB: predicated region body
PF: predicated region fallthrough
CT: control target
= control target key end

     0   :  { %14 = vsyncpa [#allocation3], 0  ;;  %s2322_s30 = smov 0   ;;  %s2807_s0 = inlined_call_operand.vmem [shape: f32[256,16], index: 0, kind: input, shape index: {}]   ;;  %s2808_s1 = inlined_call_operand.vmem [shape: bf16[16,256], index: 1, kind: input, shape index: {}]   ;;  %s2809_s2 = inlined_call_operand.vmem [shape: f32[1,256], index: 2, kind: input, shape index: {}]   ;;  %s2810_s3 = inlined_call_operand.vmem [shape: bf16[256,256], index: 3, kind: input, shape index: {}]   ;;  %s2811_s4 = inlined_call_operand.vmem [shape: f32[1,256], index: 4, kind: input, shape index: {}]   ;;  %s2812_s5 = inlined_call_operand.hbm [shape: bf16[256,256], index: 5, kind: input, shape index: {}]   ;;  %s2813_s6 = inlined_call_operand.vmem [shape: f32[1,256], index: 6, kind: input, shape index: {}]   ;;  %s2814_s7 = inlined_call_operand.vmem [shape: bf16[256,8], index: 7, kind: input, shape index: {}]   ;;  %s2815_s8 = inlined_call_operand.vmem [shape: f32[1,8], index: 8, kind: input, shape index: {}]   ;;  %s2816_s9 = inlined_call_operand.vmem [shape: f32[256,8], index: 9, kind: output, shape index: {}]  }
   0x1 LB: > { %s268_s12 = sshll.u32 %s2812_s5, 4  ;;  %s1766_s13 = sadd.s32 4294967295, %s2267_s30   ;;  %s2267_s30 = sphi %s2322_s30, %s20_s30   ;;  %s269_s12 = int_to_ptr.hbm [resolvable:$true] %s268_s12 }
   0x2   : > { %p1768_p0 = scmp.ge.s32.totalorder %s2267_s30, 1  ;;  %p245_p1 = scmp.lt.s32.totalorder %s2267_s30, 3 }
   0x3   : > { %p2213_p2 = scmp.eq.s32.totalorder %s1766_s13, 0  ;;  %s2269_s14 = smov [#allocation2]  }
   0x4   : > { %p246_p3 = pnand %p1768_p0, %p245_p1  ;;  %s270_s15 = sshll.u32 %s2269_s14, 4  ;;  %s271_s15 = int_to_ptr.vmem [resolvable:$true] %s270_s15 }
   0x5   : > { %s2270_s16 = smov 128   ;;  %s2271_s17 = smov 8  }
   0x6   : > { %p2209_p4 = pneg %p246_p3  ;;  %304 = sbr.rel (%p246_p3) target bundleno = 714 (0x2ca), region = 56 }
   0x8   : > { %p2210_p5 = pnand %p2213_p2, %p2209_p4 }
   0xa   : > { %2212 = dma.hbm_to_vmem [thread:$0]  (!%p2210_p5), %s269_s12, 4096, %s271_s15, [#allocation3], %s2270_s16, %s2270_s16, %s2271_s17  }
   0xb   : > { %2262 = dma.done.wait (%p2213_p2), [#allocation3], 4096  }
   0xc   : > { %2264 = vsyncadd (%p2213_p2), [#allocation3], 4294963200  ;;  %s1773_s18 = sshll.u32 %s1766_s13, 4  ;;  %v1779_v0 = vld [vmem:[%s2808_s1] sm:$0xf]  ;;  %vm396_vm0 = vcmask 130048  }
   0xd   : > { %p342_p6 = scmp.lt.s32.totalorder %s1773_s18, 31  ;;  %v2124_v1 = vld [vmem:[%s2808_s1 + $0x4] sm:$0xf0]  ;;  %v2123_v2 = vld [vmem:[%s2808_s1 + $0x4] sm:$0xf]  ;;  %vm1681_vm1 = vcmask 64512  }
   0xe   : > { %v1780_v3 = vor.u32 %v2124_v1, %v1779_v0  ;;  %v1781_v4 = vld [vmem:[%s2808_s1 + $0x8] sm:$0xf0]  ;;  %v2139_v9 = vld [vmem:[%s2810_s3 + $0x74] sm:$0xf]  ;;  %v1861_v10 = vld [vmem:[%s2810_s3 + $0x78] sm:$0xf0] }
   0xf   : > { %s2818_s18 = smov (!%p342_p6, %s1773_s18), 31  ;;  %v1784_v7 = vor.u32 %v2123_v2, %v1781_v4  ;;  %v2155_v11 = vld [vmem:[%s2810_s3 + $0xf4] sm:$0xf]  ;;  %v1925_v12 = vld [vmem:[%s2810_s3 + $0xf8] sm:$0xf0]  ;;  %v1864_v13 = vor.u32 %v2139_v9, %v1861_v10 }
  0x10   : > { %s1774_s19 = sshll.u32 %s2818_s18, 3  ;;  %428 = vmatpush.bf16.msra.mxu0 %v1780_v3  ;;  %v1928_v14 = vor.u32 %v2155_v11, %v1925_v12  ;;  %v2137_v15 = vld [vmem:[%s2810_s3 + $0x64] sm:$0xf]  ;;  %v1853_v16 = vld [vmem:[%s2810_s3 + $0x68] sm:$0xf0] }
  0x11   : > { %s2341_s22 = scalar_lea.vmem %s2807_s0, %s1774_s19  ;;  %477 = vmatpush.bf16.msra.mxu1 %v1784_v7  ;;  %v2153_v17 = vld [vmem:[%s2810_s3 + $0xe4] sm:$0xf]  ;;  %v1856_v18 = vor.u32 %v2137_v15, %v1853_v16  ;;  %v1917_v19 = vld [vmem:[%s2810_s3 + $0xe8] sm:$0xf0]  ;;  %v2135_v24 = vld [vmem:[%s2810_s3 + $0x54] sm:$0xf]  ;;  %s2755_s28 = scalar_lea.vmem %s2816_s9, %s1774_s19 }
  0x12   : > { %v354_v5 = vld [vmem:[%s2341_s22] sm:$0xff]  ;;  %v355_v6 = vld [vmem:[%s2341_s22 + $0x8] sm:$0xff]  ;;  %v1920_v20 = vor.u32 %v2153_v17, %v1917_v19  ;;  %v356_v21 = vld [vmem:[%s2341_s22 + $0x10] sm:$0xff] }
  0x13   : > { %v370_v8 = vpack.c.bf16 %v355_v6, %v354_v5  ;;  %v357_v22 = vld [vmem:[%s2341_s22 + $0x18] sm:$0xff]  ;;  %v2151_v26 = vld [vmem:[%s2810_s3 + $0xd4] sm:$0xf]  ;;  %v358_v30 = vld [vmem:[%s2341_s22 + $0x20] sm:$0xff] }
  0x14   : > { %863 = vmatpush.bf16.msrb.mxu0 %v1864_v13  ;;  %v371_v23 = vpack.c.bf16 %v357_v22, %v356_v21  ;;  %v1845_v25 = vld [vmem:[%s2810_s3 + $0x58] sm:$0xf0]  ;;  %v359_v31 = vld [vmem:[%s2341_s22 + $0x28] sm:$0xff]  ;;  %v2133_v33 = vld [vmem:[%s2810_s3 + $0x44] sm:$0xf] }
  0x15   : > { %1785 = vmatmul.msk.bf16.vlgmr.msra.gmra.mxu0 %vm396_vm0, %v370_v8  ;;  %912 = vmatpush.bf16.msrb.mxu1 %v1928_v14  ;;  %v1848_v27 = vor.u32 %v2135_v24, %v1845_v25  ;;  %v1909_v28 = vld [vmem:[%s2810_s3 + $0xd8] sm:$0xf0]  ;;  %v372_v32 = vpack.c.bf16 %v359_v31, %v358_v30  ;;  %v1837_v34 = vld [vmem:[%s2810_s3 + $0x48] sm:$0xf0]  ;;  %v2149_v35 = vld [vmem:[%s2810_s3 + $0xc4] sm:$0xf] }
  0x16   : > { %1793 = vmatmul.msk.bf16.vlgmr.msra.gmra.mxu1 %vm396_vm0, %v370_v8  ;;  %v1912_v29 = vor.u32 %v2151_v26, %v1909_v28  ;;  %v1840_v36 = vor.u32 %v2133_v33, %v1837_v34  ;;  %v1901_v37 = vld [vmem:[%s2810_s3 + $0xc8] sm:$0xf0]  ;;  %v360_v39 = vld [vmem:[%s2341_s22 + $0x30] sm:$0xff]  ;;  %v361_v40 = vld [vmem:[%s2341_s22 + $0x38] sm:$0xff] }
  0x17   : > { %v1904_v38 = vor.u32 %v2149_v35, %v1901_v37  ;;  %v373_v41 = vpack.c.bf16 %v361_v40, %v360_v39  ;;  %v2131_v42 = vld [vmem:[%s2810_s3 + $0x34] sm:$0xf]  ;;  %v1829_v43 = vld [vmem:[%s2810_s3 + $0x38] sm:$0xf0]  ;;  %v362_v48 = vld [vmem:[%s2341_s22 + $0x40] sm:$0xff] }
  0x18   : > { %864 = vmatpush.bf16.msrb.mxu0 %v1856_v18  ;;  %v2147_v44 = vld [vmem:[%s2810_s3 + $0xb4] sm:$0xf]  ;;  %v1832_v45 = vor.u32 %v2131_v42, %v1829_v43  ;;  %v1893_v46 = vld [vmem:[%s2810_s3 + $0xb8] sm:$0xf0]  ;;  %v363_v49 = vld [vmem:[%s2341_s22 + $0x48] sm:$0xff] }
  0x19   : > { %913 = vmatpush.bf16.msrb.mxu1 %v1920_v20  ;;  %v1896_v47 = vor.u32 %v2147_v44, %v1893_v46  ;;  %v374_v50 = vpack.c.bf16 %v363_v49, %v362_v48  ;;  %v2129_v51 = vld [vmem:[%s2810_s3 + $0x24] sm:$0xf]  ;;  %v1821_v52 = vld [vmem:[%s2810_s3 + $0x28] sm:$0xf0]  ;;  %v1859_v56 = vld [vmem:[%s2810_s3 + $0x70] sm:$0xf] }
  0x1a   : > { %v2145_v53 = vld [vmem:[%s2810_s3 + $0xa4] sm:$0xf]  ;;  %v1824_v54 = vor.u32 %v2129_v51, %v1821_v52  ;;  %v1885_v55 = vld [vmem:[%s2810_s3 + $0xa8] sm:$0xf0]  ;;  %v2140_v57 = vld [vmem:[%s2810_s3 + $0x74] sm:$0xf0] }
  0x1b   : > { %v1888_v58 = vor.u32 %v2145_v53, %v1885_v55  ;;  %v1860_v59 = vor.u32 %v2140_v57, %v1859_v56  ;;  %v1923_v60 = vld [vmem:[%s2810_s3 + $0xf0] sm:$0xf]  ;;  %v2156_v61 = vld [vmem:[%s2810_s3 + $0xf4] sm:$0xf0]  ;;  %v1851_v2 = vld [vmem:[%s2810_s3 + $0x60] sm:$0xf] }
  0x1c   : > { %865 = vmatpush.bf16.msrb.mxu0 %v1848_v27  ;;  %v1924_v62 = vor.u32 %v2156_v61, %v1923_v60  ;;  %v364_v63 = vld [vmem:[%s2341_s22 + $0x50] sm:$0xff]  ;;  %v365_v0 = vld [vmem:[%s2341_s22 + $0x58] sm:$0xff]  ;;  %v2138_v3 = vld [vmem:[%s2810_s3 + $0x64] sm:$0xf0] }
  0x1d   : > { %914 = vmatpush.bf16.msrb.mxu1 %v1912_v29  ;;  %765 = vmatpush.bf16.msra.mxu2 %v1860_v59  ;;  %v375_v1 = vpack.c.bf16 %v365_v0, %v364_v63  ;;  %v1915_v4 = vld [vmem:[%s2810_s3 + $0xe0] sm:$0xf]  ;;  %v1852_v5 = vor.u32 %v2138_v3, %v1851_v2  ;;  %v2154_v6 = vld [vmem:[%s2810_s3 + $0xe4] sm:$0xf0]  ;;  %v2127_v8 = vld [vmem:[%s2810_s3 + $0x14] sm:$0xf] }
  0x1e   : > { %814 = vmatpush.bf16.msra.mxu3 %v1924_v62  ;;  %v1916_v7 = vor.u32 %v2154_v6, %v1915_v4  ;;  %v1813_v9 = vld [vmem:[%s2810_s3 + $0x18] sm:$0xf0]  ;;  %v1843_v10 = vld [vmem:[%s2810_s3 + $0x50] sm:$0xf]  ;;  %v2136_v12 = vld [vmem:[%s2810_s3 + $0x54] sm:$0xf0] }
  0x1f   : > { %v1816_v11 = vor.u32 %v2127_v8, %v1813_v9  ;;  %v1907_v13 = vld [vmem:[%s2810_s3 + $0xd0] sm:$0xf]  ;;  %v2152_v14 = vld [vmem:[%s2810_s3 + $0xd4] sm:$0xf0]  ;;  %v1844_v15 = vor.u32 %v2136_v12, %v1843_v10  ;;  %v2143_v17 = vld [vmem:[%s2810_s3 + $0x94] sm:$0xf] }
  0x20   : > { %866 = vmatpush.bf16.msrb.mxu0 %v1840_v36  ;;  %v1908_v16 = vor.u32 %v2152_v14, %v1907_v13  ;;  %v1877_v18 = vld [vmem:[%s2810_s3 + $0x98] sm:$0xf0]  ;;  %v1835_v19 = vld [vmem:[%s2810_s3 + $0x40] sm:$0xf]  ;;  %v2134_v21 = vld [vmem:[%s2810_s3 + $0x44] sm:$0xf0] }
  0x21   : > { %915 = vmatpush.bf16.msrb.mxu1 %v1904_v38  ;;  %766 = vmatpush.bf16.msra.mxu2 %v1852_v5  ;;  %v1880_v20 = vor.u32 %v2143_v17, %v1877_v18  ;;  %v1899_v22 = vld [vmem:[%s2810_s3 + $0xc0] sm:$0xf]  ;;  %v1836_v24 = vor.u32 %v2134_v21, %v1835_v19  ;;  %v367_v27 = vld [vmem:[%s2341_s22 + $0x68] sm:$0xff]  ;;  %v1827_v28 = vld [vmem:[%s2810_s3 + $0x30] sm:$0xf] }
  0x22   : > { %815 = vmatpush.bf16.msra.mxu3 %v1916_v7  ;;  %v366_v26 = vld [vmem:[%s2341_s22 + $0x60] sm:$0xff]  ;;  %v2132_v29 = vld [vmem:[%s2810_s3 + $0x34] sm:$0xf0]  ;;  %v1891_v30 = vld [vmem:[%s2810_s3 + $0xb0] sm:$0xf] }
  0x23   : > { %v376_v31 = vpack.c.bf16 %v367_v27, %v366_v26  ;;  %v2148_v33 = vld [vmem:[%s2810_s3 + $0xb4] sm:$0xf0]  ;;  %v1819_v35 = vld [vmem:[%s2810_s3 + $0x20] sm:$0xf]  ;;  %v2130_v36 = vld [vmem:[%s2810_s3 + $0x24] sm:$0xf0] }
  0x24   : > { %867 = vmatpush.bf16.msrb.mxu0 %v1832_v45  ;;  %v1892_v34 = vor.u32 %v2148_v33, %v1891_v30  ;;  %v1820_v37 = vor.u32 %v2130_v36, %v1819_v35  ;;  %v1883_v38 = vld [vmem:[%s2810_s3 + $0xa0] sm:$0xf]  ;;  %v2146_v39 = vld [vmem:[%s2810_s3 + $0xa4] sm:$0xf0]  ;;  %v1805_v42 = vld [vmem:[%s2810_s3 + $0x8] sm:$0xf0] }
  0x25   : > { %1786 = vmatmul.msk.bf16.gmra.mxu0 %vm396_vm0, %v371_v23  ;;  %916 = vmatpush.bf16.msrb.mxu1 %v1896_v47  ;;  %v1884_v40 = vor.u32 %v2146_v39, %v1883_v38  ;;  %v1811_v44 = vld [vmem:[%s2810_s3 + $0x10] sm:$0xf]  ;;  %v2128_v45 = vld [vmem:[%s2810_s3 + $0x14] sm:$0xf0]  ;;  %v1869_v51 = vld [vmem:[%s2810_s3 + $0x88] sm:$0xf0] }
  0x26   : > { %1794 = vmatmul.msk.bf16.gmra.mxu1 %vm396_vm0, %v371_v23  ;;  %v2150_v23 = vld [vmem:[%s2810_s3 + $0xc4] sm:$0xf0]  ;;  %767 = vmatpush.bf16.msra.mxu2 %v1844_v15  ;;  %v1875_v46 = vld [vmem:[%s2810_s3 + $0x90] sm:$0xf]  ;;  %v1812_v47 = vor.u32 %v2128_v45, %v1811_v44  ;;  %v2144_v48 = vld [vmem:[%s2810_s3 + $0x94] sm:$0xf0] }
  0x27   : > { %816 = vmatpush.bf16.msra.mxu3 %v1908_v16  ;;  %v1900_v25 = vor.u32 %v2150_v23, %v1899_v22  ;;  %v1876_v49 = vor.u32 %v2144_v48, %v1875_v46  ;;  %v1803_v52 = vld [vmem:[%s2810_s3] sm:$0xf]  ;;  %v2142_v56 = vld [vmem:[%s2810_s3 + $0x84] sm:$0xf0]  ;;  %v368_v57 = vld [vmem:[%s2341_s22 + $0x70] sm:$0xff] }
  0x28   : > { %868 = vmatpush.bf16.msrb.mxu0 %v1824_v54  ;;  %v2126_v54 = vld [vmem:[%s2810_s3 + $0x4] sm:$0xf0]  ;;  %v1867_v55 = vld [vmem:[%s2810_s3 + $0x80] sm:$0xf]  ;;  %v1987_v3 = vld [vmem:[#allocation2 + $0x70] sm:$0xf] }
  0x29   : > { %917 = vmatpush.bf16.msrb.mxu1 %v1888_v58  ;;  %v369_v58 = vld [vmem:[%s2341_s22 + $0x78] sm:$0xff]  ;;  %v1804_v59 = vor.u32 %v2126_v54, %v1803_v52  ;;  %v1868_v60 = vor.u32 %v2142_v56, %v1867_v55  ;;  %v380_v62 = vld [vmem:[%s2809_s2] sm:$0x3]  ;;  %v2051_v6 = vld [vmem:[#allocation2 + $0xf0] sm:$0xf] }
  0x2a   : > { %768 = vmatpush.bf16.msra.mxu2 %v1836_v24  ;;  %v377_v61 = vpack.c.bf16 %v369_v58, %v368_v57  ;;  %v2584_v2 = vperm.slane %v380_v62, 1  ;;  %v2172_v4 = vld [vmem:[#allocation2 + $0x74] sm:$0xf0]  ;;  %v2171_v19 = vld [vmem:[#allocation2 + $0x74] sm:$0xf] }
  0x2b   : > { %817 = vmatpush.bf16.msra.mxu3 %v1900_v25  ;;  %v1988_v5 = vor.u32 %v2172_v4, %v1987_v3  ;;  %v2188_v7 = vld [vmem:[#allocation2 + $0xf4] sm:$0xf0]  ;;  %v2187_v23 = vld [vmem:[#allocation2 + $0xf4] sm:$0xf]  ;;  %v2053_v24 = vld [vmem:[#allocation2 + $0xf8] sm:$0xf0] }
  0x2c   : > { %869 = vmatpush.bf16.msrb.mxu0 %v1816_v11  ;;  %v2052_v8 = vor.u32 %v2188_v7, %v2051_v6  ;;  %v2056_v26 = vor.u32 %v2187_v23, %v2053_v24  ;;  %v2170_v30 = vld [vmem:[#allocation2 + $0x64] sm:$0xf0]  ;;  %v2169_v45 = vld [vmem:[#allocation2 + $0x64] sm:$0xf]  ;;  %v1981_v46 = vld [vmem:[#allocation2 + $0x68] sm:$0xf0] }
  0x2d   : > { %918 = vmatpush.bf16.msrb.mxu1 %v1880_v20  ;;  %v1989_v20 = vld [vmem:[#allocation2 + $0x78] sm:$0xf0]  ;;  %v2186_v33 = vld [vmem:[#allocation2 + $0xe4] sm:$0xf0]  ;;  %v1984_v48 = vor.u32 %v2169_v45, %v1981_v46  ;;  %v1971_v55 = vld [vmem:[#allocation2 + $0x50] sm:$0xf] }
  0x2e   : > { %v1992_v22 = vor.u32 %v2171_v19, %v1989_v20  ;;  %v2168_v56 = vld [vmem:[#allocation2 + $0x54] sm:$0xf0]  ;;  %v2035_v58 = vld [vmem:[#allocation2 + $0xd0] sm:$0xf]  ;;  %v1963_v19 = vld [vmem:[#allocation2 + $0x40] sm:$0xf] }
  0x2f   : > { %818 = vmatpush.bf16.msra.mxu3 %v1892_v34  ;;  %v1972_v57 = vor.u32 %v2168_v56, %v1971_v55  ;;  %v2166_v20 = vld [vmem:[#allocation2 + $0x44] sm:$0xf0]  ;;  %v1955_v45 = vld [vmem:[#allocation2 + $0x30] sm:$0xf]  ;;  %v2164_v46 = vld [vmem:[#allocation2 + $0x34] sm:$0xf0] }
  0x30   : > { %v2182_v23 = vld [vmem:[#allocation2 + $0xc4] sm:$0xf0] }
  0x33   : > { %819 = vmatpush.bf16.msra.mxu3 %v1884_v40 }
  0x35   : > { %1787 = vmatmul.msk.bf16.gmra.mxu0 %vm396_vm0, %v372_v32 }
  0x36   : > { %1795 = vmatmul.msk.bf16.gmra.mxu1 %vm396_vm0, %v372_v32  ;;  %v1828_v32 = vor.u32 %v2132_v29, %v1827_v28  ;;  %v1979_v29 = vld [vmem:[#allocation2 + $0x60] sm:$0xf] }
  0x37   : > { %820 = vmatpush.bf16.msra.mxu3 %v1876_v49  ;;  %v2185_v49 = vld [vmem:[#allocation2 + $0xe4] sm:$0xf] }
  0x38   : > { %769 = vmatpush.bf16.msra.mxu2 %v1828_v32  ;;  %v2043_v32 = vld [vmem:[#allocation2 + $0xe0] sm:$0xf] }
  0x39   : > { %v2044_v34 = vor.u32 %v2186_v33, %v2043_v32 }
  0x3b   : > { %821 = vmatpush.bf16.msra.mxu3 %v1868_v60 }
  0x3c   : > { %770 = vmatpush.bf16.msra.mxu2 %v1820_v37 }
  0x3f   : > { %1256 = vmatpush.bf16.msrb.mxu3 %v2052_v8 }
  0x40   : > { %771 = vmatpush.bf16.msra.mxu2 %v1812_v47 }
  0x43   : > { %1257 = vmatpush.bf16.msrb.mxu3 %v2044_v34 }
  0x44   : > { %772 = vmatpush.bf16.msra.mxu2 %v1804_v59  ;;  %v2184_v59 = vld [vmem:[#allocation2 + $0xd4] sm:$0xf0] }
  0x45   : > { %1788 = vmatmul.msk.bf16.gmra.mxu0 %vm396_vm0, %v373_v41  ;;  %v2036_v60 = vor.u32 %v2184_v59, %v2035_v58 }
  0x46   : > { %1796 = vmatmul.msk.bf16.gmra.mxu1 %vm396_vm0, %v373_v41  ;;  %v2125_v41 = vld [vmem:[%s2810_s3 + $0x4] sm:$0xf] }
  0x47   : > { %v1808_v43 = vor.u32 %v2125_v41, %v1805_v42  ;;  %1258 = vmatpush.bf16.msrb.mxu3 %v2036_v60 }
  0x48   : > { %1207 = vmatpush.bf16.msrb.mxu2 %v1988_v5 }
  0x49   : > { %870 = vmatpush.bf16.msrb.mxu0 %v1808_v43 }
  0x4d   : > { %1305 = vmatpush.bf16.msra.mxu0 %v1992_v22  ;;  %v2027_v22 = vld [vmem:[#allocation2 + $0xc0] sm:$0xf] }
  0x4e   : > { %v2028_v24 = vor.u32 %v2182_v23, %v2027_v22 }
  0x50   : > { %1259 = vmatpush.bf16.msrb.mxu3 %v2028_v24 }
  0x51   : > { %1306 = vmatpush.bf16.msra.mxu0 %v1984_v48  ;;  %v2019_v48 = vld [vmem:[#allocation2 + $0xb0] sm:$0xf] }
  0x55   : > { %1789 = vmatmul.msk.bf16.gmra.mxu0 %vm396_vm0, %v374_v50 }
  0x56   : > { %1797 = vmatmul.msk.bf16.gmra.mxu1 %vm396_vm0, %v374_v50  ;;  %v2141_v50 = vld [vmem:[%s2810_s3 + $0x84] sm:$0xf] }
  0x57   : > { %v1872_v53 = vor.u32 %v2141_v50, %v1869_v51  ;;  %v2045_v50 = vld [vmem:[#allocation2 + $0xe8] sm:$0xf0] }
  0x58   : > { %v2048_v52 = vor.u32 %v2185_v49, %v2045_v50  ;;  %v2180_v49 = vld [vmem:[#allocation2 + $0xb4] sm:$0xf0] }
  0x59   : > { %919 = vmatpush.bf16.msrb.mxu1 %v1872_v53  ;;  %v2020_v50 = vor.u32 %v2180_v49, %v2019_v48 }
  0x5b   : > { %1260 = vmatpush.bf16.msrb.mxu3 %v2020_v50 }
  0x5d   : > { %1354 = vmatpush.bf16.msra.mxu1 %v2056_v26 }
  0x61   : > { %1355 = vmatpush.bf16.msra.mxu1 %v2048_v52 }
  0x65   : > { %1790 = vmatmul.msk.bf16.gmra.mxu0 %vm396_vm0, %v375_v1 }
  0x66   : > { %1798 = vmatmul.msk.bf16.gmra.mxu1 %vm396_vm0, %v375_v1  ;;  %v2582_v1 = vperm.slane %v380_v62, 0 }
  0x75   : > { %1791 = vmatmul.msk.bf16.gmra.mxu0 %vm396_vm0, %v376_v31 }
  0x76   : > { %1799 = vmatmul.msk.bf16.gmra.mxu1 %vm396_vm0, %v376_v31  ;;  %v1980_v31 = vor.u32 %v2170_v30, %v1979_v29 }
  0x78   : > { %1208 = vmatpush.bf16.msrb.mxu2 %v1980_v31 }
  0x7c   : > { %1209 = vmatpush.bf16.msrb.mxu2 %v1972_v57 }
  0x85   : > { %1792 = vmatmul.msk.bf16.gmra.mxu0 %vm396_vm0, %v377_v61 }
  0x86   : > { %1800 = vmatmul.msk.bf16.gmra.mxu1 %vm396_vm0, %v377_v61 }
  0x92   : > { %v430_v63 = vpop.f32.mrf.mxu0 }
  0x93   : > { %v479_v0 = vpop.f32.mrf.mxu1  ;;  %v431_v9 = vadd.f32 %v430_v63, %v2582_v1 }
  0x94   : > { %v480_v10 = vadd.f32 %v479_v0, %v2584_v2 }
  0x95   : > { %v519_v15 = vmax.f32 %v431_v9, 0.0  ;;  %v2167_v9 = vld [vmem:[#allocation2 + $0x54] sm:$0xf] }
  0x96   : > { %v520_v17 = vmax.f32 %v480_v10, 0.0  ;;  %v1973_v10 = vld [vmem:[#allocation2 + $0x58] sm:$0xf0] }
  0x9a   : > { %v432_v11 = vpop.f32.mrf.mxu0 }
  0x9b   : > { %v433_v12 = vadd.f32 %v432_v11, %v2582_v1  ;;  %v481_v13 = vpop.f32.mrf.mxu1 }
  0x9c   : > { %v482_v14 = vadd.f32 %v481_v13, %v2584_v2  ;;  %v2183_v13 = vld [vmem:[#allocation2 + $0xd4] sm:$0xf] }
  0x9d   : > { %v521_v16 = vmax.f32 %v433_v12, 0.0  ;;  %v1976_v12 = vor.u32 %v2167_v9, %v1973_v10  ;;  %v1947_v9 = vld [vmem:[#allocation2 + $0x20] sm:$0xf]  ;;  %v2162_v10 = vld [vmem:[#allocation2 + $0x24] sm:$0xf0] }
  0x9e   : > { %v522_v18 = vmax.f32 %v482_v14, 0.0  ;;  %v2037_v14 = vld [vmem:[#allocation2 + $0xd8] sm:$0xf0] }
  0x9f   : > { %v551_v21 = vpack.c.bf16 %v521_v16, %v519_v15  ;;  %v2040_v16 = vor.u32 %v2183_v13, %v2037_v14  ;;  %1307 = vmatpush.bf16.msra.mxu0 %v1976_v12  ;;  %v2011_v12 = vld [vmem:[#allocation2 + $0xa0] sm:$0xf]  ;;  %v2178_v13 = vld [vmem:[#allocation2 + $0xa4] sm:$0xf0] }
  0xa0   : > { %v552_v25 = vpack.c.bf16 %v522_v18, %v520_v17  ;;  %v2012_v14 = vor.u32 %v2178_v13, %v2011_v12 }
  0xa1   : > { %773 = vmatmul.bf16.vlgmr.msra.gmra.mxu2 %v551_v21  ;;  %871 = vmatmul.bf16.vlgmr.msrb.gmra.mxu0 %v551_v21  ;;  %v1964_v21 = vor.u32 %v2166_v20, %v1963_v19 }
  0xa2   : > { %822 = vmatmul.bf16.vlgmr.msra.gmra.mxu3 %v552_v25  ;;  %920 = vmatmul.bf16.vlgmr.msrb.gmra.mxu1 %v552_v25  ;;  %v435_v27 = vpop.f32.mrf.mxu0 }
  0xa3   : > { %v484_v28 = vpop.f32.mrf.mxu1  ;;  %v436_v35 = vadd.f32 %v435_v27, %v2582_v1  ;;  %1356 = vmatpush.bf16.msra.mxu1 %v2040_v16  ;;  %1210 = vmatpush.bf16.msrb.mxu2 %v1964_v21 }
  0xa4   : > { %v485_v36 = vadd.f32 %v484_v28, %v2584_v2  ;;  %1261 = vmatpush.bf16.msrb.mxu3 %v2012_v14 }
  0xa5   : > { %v523_v41 = vmax.f32 %v436_v35, 0.0  ;;  %v2165_v35 = vld [vmem:[#allocation2 + $0x44] sm:$0xf] }
  0xa6   : > { %v524_v43 = vmax.f32 %v485_v36, 0.0  ;;  %v1965_v36 = vld [vmem:[#allocation2 + $0x48] sm:$0xf0] }
  0xaa   : > { %v437_v37 = vpop.f32.mrf.mxu0 }
  0xab   : > { %v438_v38 = vadd.f32 %v437_v37, %v2582_v1  ;;  %v486_v39 = vpop.f32.mrf.mxu1 }
  0xac   : > { %v487_v40 = vadd.f32 %v486_v39, %v2584_v2  ;;  %v2181_v39 = vld [vmem:[#allocation2 + $0xc4] sm:$0xf] }
  0xad   : > { %v525_v42 = vmax.f32 %v438_v38, 0.0  ;;  %v1968_v38 = vor.u32 %v2165_v35, %v1965_v36  ;;  %v2160_v35 = vld [vmem:[#allocation2 + $0x14] sm:$0xf0]  ;;  %v2003_v36 = vld [vmem:[#allocation2 + $0x90] sm:$0xf] }
  0xae   : > { %v526_v44 = vmax.f32 %v487_v40, 0.0  ;;  %v2029_v40 = vld [vmem:[#allocation2 + $0xc8] sm:$0xf0] }
  0xaf   : > { %v553_v47 = vpack.c.bf16 %v525_v42, %v523_v41  ;;  %v2032_v42 = vor.u32 %v2181_v39, %v2029_v40  ;;  %1308 = vmatpush.bf16.msra.mxu0 %v1968_v38  ;;  %v2176_v39 = vld [vmem:[#allocation2 + $0x94] sm:$0xf0]  ;;  %v2159_v40 = vld [vmem:[#allocation2 + $0x14] sm:$0xf] }
  0xb0   : > { %v554_v51 = vpack.c.bf16 %v526_v44, %v524_v43 }
  0xb1   : > { %778 = vmatmul.bf16.gmra.mxu2 %v553_v47  ;;  %876 = vmatmul.bf16.gmra.mxu0 %v553_v47  ;;  %v1956_v47 = vor.u32 %v2164_v46, %v1955_v45 }
  0xb2   : > { %827 = vmatmul.bf16.gmra.mxu3 %v554_v51  ;;  %925 = vmatmul.bf16.gmra.mxu1 %v554_v51  ;;  %v440_v53 = vpop.f32.mrf.mxu0 }
  0xb3   : > { %v489_v54 = vpop.f32.mrf.mxu1  ;;  %v441_v61 = vadd.f32 %v440_v53, %v2582_v1  ;;  %1357 = vmatpush.bf16.msra.mxu1 %v2032_v42  ;;  %1211 = vmatpush.bf16.msrb.mxu2 %v1956_v47  ;;  %v2004_v42 = vor.u32 %v2176_v39, %v2003_v36 }
  0xb4   : > { %v490_v62 = vadd.f32 %v489_v54, %v2584_v2 }
  0xb5   : > { %v527_v5 = vmax.f32 %v441_v61, 0.0  ;;  %v2163_v61 = vld [vmem:[#allocation2 + $0x34] sm:$0xf]  ;;  %1262 = vmatpush.bf16.msrb.mxu3 %v2004_v42 }
  0xb6   : > { %v528_v7 = vmax.f32 %v490_v62, 0.0  ;;  %v1957_v62 = vld [vmem:[#allocation2 + $0x38] sm:$0xf0] }
  0xba   : > { %v442_v63 = vpop.f32.mrf.mxu0 }
  0xbb   : > { %v443_v0 = vadd.f32 %v442_v63, %v2582_v1  ;;  %v491_v3 = vpop.f32.mrf.mxu1 }
  0xbc   : > { %v492_v4 = vadd.f32 %v491_v3, %v2584_v2  ;;  %v2179_v3 = vld [vmem:[#allocation2 + $0xb4] sm:$0xf] }
  0xbd   : > { %v529_v6 = vmax.f32 %v443_v0, 0.0  ;;  %v1960_v0 = vor.u32 %v2163_v61, %v1957_v62  ;;  %v1931_v62 = vld [vmem:[#allocation2] sm:$0xf] }
  0xbe   : > { %v530_v8 = vmax.f32 %v492_v4, 0.0  ;;  %v2021_v4 = vld [vmem:[#allocation2 + $0xb8] sm:$0xf0] }
  0xbf   : > { %v555_v11 = vpack.c.bf16 %v529_v6, %v527_v5  ;;  %v2024_v6 = vor.u32 %v2179_v3, %v2021_v4  ;;  %1309 = vmatpush.bf16.msra.mxu0 %v1960_v0 }
  0xc0   : > { %v556_v15 = vpack.c.bf16 %v530_v8, %v528_v7 }
  0xc1   : > { %783 = vmatmul.bf16.gmra.mxu2 %v555_v11  ;;  %881 = vmatmul.bf16.gmra.mxu0 %v555_v11  ;;  %v1948_v11 = vor.u32 %v2162_v10, %v1947_v9 }
  0xc2   : > { %832 = vmatmul.bf16.gmra.mxu3 %v556_v15  ;;  %930 = vmatmul.bf16.gmra.mxu1 %v556_v15  ;;  %v445_v17 = vpop.f32.mrf.mxu0 }
  0xc3   : > { %v494_v18 = vpop.f32.mrf.mxu1  ;;  %v446_v25 = vadd.f32 %v445_v17, %v2582_v1  ;;  %1358 = vmatpush.bf16.msra.mxu1 %v2024_v6  ;;  %1212 = vmatpush.bf16.msrb.mxu2 %v1948_v11  ;;  %v2174_v6 = vld [vmem:[#allocation2 + $0x84] sm:$0xf0]  ;;  %v1997_v11 = vld [vmem:[#allocation2 + $0x88] sm:$0xf0] }
  0xc4   : > { %v495_v26 = vadd.f32 %v494_v18, %v2584_v2 }
  0xc5   : > { %v531_v31 = vmax.f32 %v446_v25, 0.0  ;;  %v2161_v25 = vld [vmem:[#allocation2 + $0x24] sm:$0xf] }
  0xc6   : > { %v532_v33 = vmax.f32 %v495_v26, 0.0  ;;  %v1949_v26 = vld [vmem:[#allocation2 + $0x28] sm:$0xf0] }
  0xca   : > { %v447_v27 = vpop.f32.mrf.mxu0 }
  0xcb   : > { %v448_v28 = vadd.f32 %v447_v27, %v2582_v1  ;;  %v496_v29 = vpop.f32.mrf.mxu1 }
  0xcc   : > { %v497_v30 = vadd.f32 %v496_v29, %v2584_v2  ;;  %v2177_v29 = vld [vmem:[#allocation2 + $0xa4] sm:$0xf] }
  0xcd   : > { %v533_v32 = vmax.f32 %v448_v28, 0.0  ;;  %v1952_v28 = vor.u32 %v2161_v25, %v1949_v26 }
  0xce   : > { %v534_v34 = vmax.f32 %v497_v30, 0.0  ;;  %v2013_v30 = vld [vmem:[#allocation2 + $0xa8] sm:$0xf0] }
  0xcf   : > { %v557_v37 = vpack.c.bf16 %v533_v32, %v531_v31  ;;  %v2016_v32 = vor.u32 %v2177_v29, %v2013_v30  ;;  %1310 = vmatpush.bf16.msra.mxu0 %v1952_v28 }
  0xd0   : > { %v558_v41 = vpack.c.bf16 %v534_v34, %v532_v33  ;;  %v1939_v34 = vld [vmem:[#allocation2 + $0x10] sm:$0xf] }
  0xd1   : > { %788 = vmatmul.bf16.gmra.mxu2 %v557_v37  ;;  %886 = vmatmul.bf16.gmra.mxu0 %v557_v37  ;;  %v1940_v38 = vor.u32 %v2160_v35, %v1939_v34 }
  0xd2   : > { %837 = vmatmul.bf16.gmra.mxu3 %v558_v41  ;;  %935 = vmatmul.bf16.gmra.mxu1 %v558_v41  ;;  %v450_v43 = vpop.f32.mrf.mxu0  ;;  %v1941_v41 = vld [vmem:[#allocation2 + $0x18] sm:$0xf0] }
  0xd3   : > { %v499_v44 = vpop.f32.mrf.mxu1  ;;  %v451_v51 = vadd.f32 %v450_v43, %v2582_v1  ;;  %1359 = vmatpush.bf16.msra.mxu1 %v2016_v32  ;;  %v1944_v43 = vor.u32 %v2159_v40, %v1941_v41  ;;  %1213 = vmatpush.bf16.msrb.mxu2 %v1940_v38  ;;  %v2204_v38 = vld [vmem:[%s2814_s7 + $0x78] sm:$0xff] }
  0xd4   : > { %v500_v52 = vadd.f32 %v499_v44, %v2584_v2 }
  0xd5   : > { %v535_v57 = vmax.f32 %v451_v51, 0.0  ;;  %1311 = vmatpush.bf16.msra.mxu0 %v1944_v43 }
  0xd6   : > { %v536_v59 = vmax.f32 %v500_v52, 0.0 }
  0xda   : > { %v452_v53 = vpop.f32.mrf.mxu0 }
  0xdb   : > { %v453_v54 = vadd.f32 %v452_v53, %v2582_v1  ;;  %v501_v55 = vpop.f32.mrf.mxu1 }
  0xdc   : > { %v502_v56 = vadd.f32 %v501_v55, %v2584_v2 }
  0xdd   : > { %v537_v58 = vmax.f32 %v453_v54, 0.0 }
  0xde   : > { %v538_v60 = vmax.f32 %v502_v56, 0.0 }
  0xdf   : > { %v559_v63 = vpack.c.bf16 %v537_v58, %v535_v57  ;;  %v2175_v58 = vld [vmem:[#allocation2 + $0x94] sm:$0xf] }
  0xe0   : > { %v560_v5 = vpack.c.bf16 %v538_v60, %v536_v59  ;;  %v2005_v59 = vld [vmem:[#allocation2 + $0x98] sm:$0xf0] }
  0xe1   : > { %793 = vmatmul.bf16.gmra.mxu2 %v559_v63  ;;  %891 = vmatmul.bf16.gmra.mxu0 %v559_v63  ;;  %v2008_v60 = vor.u32 %v2175_v58, %v2005_v59  ;;  %v2158_v63 = vld [vmem:[#allocation2 + $0x4] sm:$0xf0] }
  0xe2   : > { %842 = vmatmul.bf16.gmra.mxu3 %v560_v5  ;;  %940 = vmatmul.bf16.gmra.mxu1 %v560_v5  ;;  %v455_v7 = vpop.f32.mrf.mxu0  ;;  %v1932_v4 = vor.u32 %v2158_v63, %v1931_v62  ;;  %v1995_v5 = vld [vmem:[#allocation2 + $0x80] sm:$0xf]  ;;  %v2203_v62 = vld [vmem:[%s2814_s7 + $0x70] sm:$0xff] }
  0xe3   : > { %v504_v8 = vpop.f32.mrf.mxu1  ;;  %v456_v15 = vadd.f32 %v455_v7, %v2582_v1  ;;  %1360 = vmatpush.bf16.msra.mxu1 %v2008_v60  ;;  %v2173_v7 = vld [vmem:[#allocation2 + $0x84] sm:$0xf]  ;;  %v1996_v10 = vor.u32 %v2174_v6, %v1995_v5 }
  0xe4   : > { %v505_v16 = vadd.f32 %v504_v8, %v2584_v2  ;;  %1214 = vmatpush.bf16.msrb.mxu2 %v1932_v4  ;;  %v2000_v13 = vor.u32 %v2173_v7, %v1997_v11 }
  0xe5   : > { %v539_v21 = vmax.f32 %v456_v15, 0.0  ;;  %1263 = vmatpush.bf16.msrb.mxu3 %v1996_v10 }
  0xe6   : > { %v540_v23 = vmax.f32 %v505_v16, 0.0 }
  0xe7   : > { %1361 = vmatpush.bf16.msra.mxu1 %v2000_v13 }
  0xe9   : > { %1632 = vmatpush.bf16.msra.mxu3 %v2204_v38 }
  0xea   : > { %v457_v17 = vpop.f32.mrf.mxu0 }
  0xeb   : > { %v458_v18 = vadd.f32 %v457_v17, %v2582_v1  ;;  %v506_v19 = vpop.f32.mrf.mxu1 }
  0xec   : > { %v507_v20 = vadd.f32 %v506_v19, %v2584_v2 }
  0xed   : > { %v541_v22 = vmax.f32 %v458_v18, 0.0  ;;  %1633 = vmatpush.bf16.msra.mxu3 %v2203_v62 }
  0xee   : > { %v542_v24 = vmax.f32 %v507_v20, 0.0  ;;  %v2157_v20 = vld [vmem:[#allocation2 + $0x4] sm:$0xf] }
  0xef   : > { %v561_v27 = vpack.c.bf16 %v541_v22, %v539_v21  ;;  %v1933_v21 = vld [vmem:[#allocation2 + $0x8] sm:$0xf0] }
  0xf0   : > { %v562_v31 = vpack.c.bf16 %v542_v24, %v540_v23 }
  0xf1   : > { %798 = vmatmul.bf16.gmra.mxu2 %v561_v27  ;;  %896 = vmatmul.bf16.gmra.mxu0 %v561_v27 }
  0xf2   : > { %847 = vmatmul.bf16.gmra.mxu3 %v562_v31  ;;  %945 = vmatmul.bf16.gmra.mxu1 %v562_v31  ;;  %v460_v33 = vpop.f32.mrf.mxu0 }
  0xf3   : > { %v509_v37 = vpop.f32.mrf.mxu1  ;;  %v461_v44 = vadd.f32 %v460_v33, %v2582_v1 }
  0xf4   : > { %v510_v45 = vadd.f32 %v509_v37, %v2584_v2  ;;  %v2196_v37 = vld [vmem:[%s2814_s7 + $0x38] sm:$0xff] }
  0xf5   : > { %v543_v50 = vmax.f32 %v461_v44, 0.0  ;;  %1583 = vmatpush.bf16.msra.mxu2 %v2196_v37 }
  0xf6   : > { %v544_v52 = vmax.f32 %v510_v45, 0.0 }
  0xfa   : > { %v462_v46 = vpop.f32.mrf.mxu0 }
  0xfb   : > { %v463_v47 = vadd.f32 %v462_v46, %v2582_v1  ;;  %v511_v48 = vpop.f32.mrf.mxu1 }
  0xfc   : > { %v512_v49 = vadd.f32 %v511_v48, %v2584_v2 }
  0xfd   : > { %v545_v51 = vmax.f32 %v463_v47, 0.0 }
  0xfe   : > { %v546_v53 = vmax.f32 %v512_v49, 0.0 }
  0xff   : > { %v563_v54 = vpack.c.bf16 %v545_v51, %v543_v50 }
 0x100   : > { %v564_v55 = vpack.c.bf16 %v546_v53, %v544_v52 }
 0x101   : > { %803 = vmatmul.bf16.gmra.mxu2 %v563_v54  ;;  %901 = vmatmul.bf16.gmra.mxu0 %v563_v54 }
 0x102   : > { %852 = vmatmul.bf16.gmra.mxu3 %v564_v55  ;;  %950 = vmatmul.bf16.gmra.mxu1 %v564_v55  ;;  %v465_v56 = vpop.f32.mrf.mxu0 }
 0x103   : > { %v514_v57 = vpop.f32.mrf.mxu1  ;;  %v466_v61 = vadd.f32 %v465_v56, %v2582_v1 }
 0x104   : > { %v515_v0 = vadd.f32 %v514_v57, %v2584_v2 }
 0x105   : > { %v547_v14 = vmax.f32 %v466_v61, 0.0  ;;  %v2195_v61 = vld [vmem:[%s2814_s7 + $0x30] sm:$0xff] }
 0x106   : > { %v548_v16 = vmax.f32 %v515_v0, 0.0  ;;  %1584 = vmatpush.bf16.msra.mxu2 %v2195_v61 }
 0x10a   : > { %v467_v3 = vpop.f32.mrf.mxu0 }
 0x10b   : > { %v468_v8 = vadd.f32 %v467_v3, %v2582_v1  ;;  %v516_v9 = vpop.f32.mrf.mxu1  ;;  %v1936_v1 = vor.u32 %v2157_v20, %v1933_v21 }
 0x10c   : > { %v517_v12 = vadd.f32 %v516_v9, %v2584_v2  ;;  %v599_v2 = vld [vmem:[%s2811_s4] sm:$0x3] }
 0x10d   : > { %v549_v15 = vmax.f32 %v468_v8, 0.0  ;;  %1312 = vmatpush.bf16.msra.mxu0 %v1936_v1  ;;  %v2621_v23 = vperm.slane %v599_v2, 1  ;;  %v2624_v27 = vperm.slane %v599_v2, 0 }
 0x10e   : > { %v550_v17 = vmax.f32 %v517_v12, 0.0 }
 0x10f   : > { %v565_v18 = vpack.c.bf16 %v549_v15, %v547_v14 }
 0x110   : > { %v566_v19 = vpack.c.bf16 %v550_v17, %v548_v16 }
 0x111   : > { %808 = vmatmul.bf16.gmra.mxu2 %v565_v18  ;;  %906 = vmatmul.bf16.gmra.mxu0 %v565_v18 }
 0x112   : > { %857 = vmatmul.bf16.gmra.mxu3 %v566_v19  ;;  %955 = vmatmul.bf16.gmra.mxu1 %v566_v19 }
 0x11e   : > { %v872_v22 = vpop.f32.mrf.mxu0 }
 0x11f   : > { %v921_v24 = vpop.f32.mrf.mxu1  ;;  %v873_v25 = vadd.f32 %v872_v22, %v2621_v23 }
 0x121   : > { %v922_v30 = vadd.f32 %v921_v24, %v873_v25 }
 0x123   : > { %v962_v35 = vmax.f32 %v922_v30, 0.0 }
 0x124   : > { %v774_v26 = vpop.f32.mrf.mxu2 }
 0x125   : > { %v823_v28 = vpop.f32.mrf.mxu3  ;;  %v775_v33 = vadd.f32 %v774_v26, %v2624_v27 }
 0x126   : > { %v874_v29 = vpop.f32.mrf.mxu0 }
 0x127   : > { %v875_v31 = vadd.f32 %v874_v29, %v2621_v23  ;;  %v923_v32 = vpop.f32.mrf.mxu1  ;;  %v824_v40 = vadd.f32 %v823_v28, %v775_v33  ;;  %v2194_v28 = vld [vmem:[%s2814_s7 + $0x28] sm:$0xff] }
 0x128   : > { %v2202_v29 = vld [vmem:[%s2814_s7 + $0x68] sm:$0xff]  ;;  %1585 = vmatpush.bf16.msra.mxu2 %v2194_v28 }
 0x129   : > { %v924_v34 = vadd.f32 %v923_v32, %v875_v31  ;;  %v961_v47 = vmax.f32 %v824_v40, 0.0  ;;  %1634 = vmatpush.bf16.msra.mxu3 %v2202_v29 }
 0x12b   : > { %v964_v36 = vmax.f32 %v924_v34, 0.0 }
 0x12c   : > { %v776_v39 = vpop.f32.mrf.mxu2 }
 0x12d   : > { %v777_v41 = vadd.f32 %v776_v39, %v2624_v27  ;;  %v825_v42 = vpop.f32.mrf.mxu3  ;;  %v994_v43 = vpack.c.bf16 %v964_v36, %v962_v35 }
 0x12e   : > { %v877_v44 = vpop.f32.mrf.mxu0 }
 0x12f   : > { %v826_v45 = vadd.f32 %v825_v42, %v777_v41  ;;  %v926_v46 = vpop.f32.mrf.mxu1  ;;  %1264 = vmatmul.bf16.vlgmr.msrb.gmra.mxu3 %v994_v43  ;;  %1362 = vmatmul.bf16.vlgmr.msra.gmra.mxu1 %v994_v43  ;;  %v878_v49 = vadd.f32 %v877_v44, %v2621_v23 }
 0x131   : > { %v963_v48 = vmax.f32 %v826_v45, 0.0  ;;  %v927_v54 = vadd.f32 %v926_v46, %v878_v49 }
 0x133   : > { %v993_v50 = vpack.c.bf16 %v963_v48, %v961_v47  ;;  %v966_v59 = vmax.f32 %v927_v54, 0.0 }
 0x134   : > { %v779_v51 = vpop.f32.mrf.mxu2 }
 0x135   : > { %v828_v52 = vpop.f32.mrf.mxu3  ;;  %1215 = vmatmul.bf16.vlgmr.msrb.gmra.mxu2 %v993_v50  ;;  %1313 = vmatmul.bf16.vlgmr.msra.gmra.mxu0 %v993_v50  ;;  %v780_v57 = vadd.f32 %v779_v51, %v2624_v27 }
 0x136   : > { %v879_v53 = vpop.f32.mrf.mxu0 }
 0x137   : > { %v880_v55 = vadd.f32 %v879_v53, %v2621_v23  ;;  %v928_v56 = vpop.f32.mrf.mxu1  ;;  %v829_v0 = vadd.f32 %v828_v52, %v780_v57  ;;  %v2193_v52 = vld [vmem:[%s2814_s7 + $0x20] sm:$0xff] }
 0x138   : > { %v2201_v53 = vld [vmem:[%s2814_s7 + $0x60] sm:$0xff]  ;;  %1586 = vmatpush.bf16.msra.mxu2 %v2193_v52 }
 0x139   : > { %v929_v58 = vadd.f32 %v928_v56, %v880_v55  ;;  %v965_v9 = vmax.f32 %v829_v0, 0.0  ;;  %1635 = vmatpush.bf16.msra.mxu3 %v2201_v53 }
 0x13b   : > { %v968_v60 = vmax.f32 %v929_v58, 0.0 }
 0x13c   : > { %v781_v63 = vpop.f32.mrf.mxu2 }
 0x13d   : > { %v782_v3 = vadd.f32 %v781_v63, %v2624_v27  ;;  %v830_v4 = vpop.f32.mrf.mxu3  ;;  %v996_v5 = vpack.c.bf16 %v968_v60, %v966_v59 }
 0x13e   : > { %v882_v6 = vpop.f32.mrf.mxu0 }
 0x13f   : > { %v831_v7 = vadd.f32 %v830_v4, %v782_v3  ;;  %v931_v8 = vpop.f32.mrf.mxu1  ;;  %1269 = vmatmul.bf16.gmra.mxu3 %v996_v5  ;;  %1367 = vmatmul.bf16.gmra.mxu1 %v996_v5  ;;  %v883_v11 = vadd.f32 %v882_v6, %v2621_v23 }
 0x141   : > { %v967_v10 = vmax.f32 %v831_v7, 0.0  ;;  %v932_v16 = vadd.f32 %v931_v8, %v883_v11 }
 0x143   : > { %v995_v12 = vpack.c.bf16 %v967_v10, %v965_v9  ;;  %v970_v21 = vmax.f32 %v932_v16, 0.0 }
 0x144   : > { %v784_v13 = vpop.f32.mrf.mxu2 }
 0x145   : > { %v833_v14 = vpop.f32.mrf.mxu3  ;;  %1220 = vmatmul.bf16.gmra.mxu2 %v995_v12  ;;  %1318 = vmatmul.bf16.gmra.mxu0 %v995_v12  ;;  %v785_v19 = vadd.f32 %v784_v13, %v2624_v27 }
 0x146   : > { %v884_v15 = vpop.f32.mrf.mxu0 }
 0x147   : > { %v885_v17 = vadd.f32 %v884_v15, %v2621_v23  ;;  %v933_v18 = vpop.f32.mrf.mxu1  ;;  %v834_v22 = vadd.f32 %v833_v14, %v785_v19  ;;  %v2192_v14 = vld [vmem:[%s2814_s7 + $0x18] sm:$0xff] }
 0x148   : > { %v2200_v15 = vld [vmem:[%s2814_s7 + $0x58] sm:$0xff]  ;;  %1587 = vmatpush.bf16.msra.mxu2 %v2192_v14 }
 0x149   : > { %v934_v20 = vadd.f32 %v933_v18, %v885_v17  ;;  %v969_v33 = vmax.f32 %v834_v22, 0.0  ;;  %1636 = vmatpush.bf16.msra.mxu3 %v2200_v15 }
 0x14b   : > { %v972_v1 = vmax.f32 %v934_v20, 0.0 }
 0x14c   : > { %v786_v2 = vpop.f32.mrf.mxu2 }
 0x14d   : > { %v787_v24 = vadd.f32 %v786_v2, %v2624_v27  ;;  %v835_v25 = vpop.f32.mrf.mxu3  ;;  %v998_v26 = vpack.c.bf16 %v972_v1, %v970_v21 }
 0x14e   : > { %v887_v30 = vpop.f32.mrf.mxu0 }
 0x14f   : > { %v836_v31 = vadd.f32 %v835_v25, %v787_v24  ;;  %v936_v32 = vpop.f32.mrf.mxu1  ;;  %1274 = vmatmul.bf16.gmra.mxu3 %v998_v26  ;;  %1372 = vmatmul.bf16.gmra.mxu1 %v998_v26  ;;  %v888_v35 = vadd.f32 %v887_v30, %v2621_v23 }
 0x151   : > { %v971_v34 = vmax.f32 %v836_v31, 0.0  ;;  %v937_v40 = vadd.f32 %v936_v32, %v888_v35 }
 0x153   : > { %v997_v36 = vpack.c.bf16 %v971_v34, %v969_v33  ;;  %v974_v45 = vmax.f32 %v937_v40, 0.0 }
 0x154   : > { %v789_v37 = vpop.f32.mrf.mxu2 }
 0x155   : > { %v838_v38 = vpop.f32.mrf.mxu3  ;;  %1225 = vmatmul.bf16.gmra.mxu2 %v997_v36  ;;  %1323 = vmatmul.bf16.gmra.mxu0 %v997_v36  ;;  %v790_v43 = vadd.f32 %v789_v37, %v2624_v27 }
 0x156   : > { %v889_v39 = vpop.f32.mrf.mxu0 }
 0x157   : > { %v890_v41 = vadd.f32 %v889_v39, %v2621_v23  ;;  %v938_v42 = vpop.f32.mrf.mxu1  ;;  %v839_v48 = vadd.f32 %v838_v38, %v790_v43  ;;  %v2191_v38 = vld [vmem:[%s2814_s7 + $0x10] sm:$0xff] }
 0x158   : > { %v2199_v39 = vld [vmem:[%s2814_s7 + $0x50] sm:$0xff]  ;;  %1588 = vmatpush.bf16.msra.mxu2 %v2191_v38 }
 0x159   : > { %v939_v44 = vadd.f32 %v938_v42, %v890_v41  ;;  %v973_v57 = vmax.f32 %v839_v48, 0.0  ;;  %1637 = vmatpush.bf16.msra.mxu3 %v2199_v39 }
 0x15b   : > { %v976_v46 = vmax.f32 %v939_v44, 0.0 }
 0x15c   : > { %v791_v47 = vpop.f32.mrf.mxu2 }
 0x15d   : > { %v792_v49 = vadd.f32 %v791_v47, %v2624_v27  ;;  %v840_v50 = vpop.f32.mrf.mxu3  ;;  %v1000_v51 = vpack.c.bf16 %v976_v46, %v974_v45 }
 0x15e   : > { %v892_v54 = vpop.f32.mrf.mxu0 }
 0x15f   : > { %v841_v55 = vadd.f32 %v840_v50, %v792_v49  ;;  %v941_v56 = vpop.f32.mrf.mxu1  ;;  %1279 = vmatmul.bf16.gmra.mxu3 %v1000_v51  ;;  %1377 = vmatmul.bf16.gmra.mxu1 %v1000_v51  ;;  %v893_v59 = vadd.f32 %v892_v54, %v2621_v23  ;;  %v2190_v49 = vld [vmem:[%s2814_s7 + $0x8] sm:$0xff] }
 0x160   : > { %v2198_v50 = vld [vmem:[%s2814_s7 + $0x48] sm:$0xff]  ;;  %1589 = vmatpush.bf16.msra.mxu2 %v2190_v49 }
 0x161   : > { %v975_v58 = vmax.f32 %v841_v55, 0.0  ;;  %v942_v0 = vadd.f32 %v941_v56, %v893_v59  ;;  %1638 = vmatpush.bf16.msra.mxu3 %v2198_v50 }
 0x163   : > { %v999_v60 = vpack.c.bf16 %v975_v58, %v973_v57  ;;  %v978_v7 = vmax.f32 %v942_v0, 0.0 }
 0x164   : > { %v794_v61 = vpop.f32.mrf.mxu2 }
 0x165   : > { %v843_v62 = vpop.f32.mrf.mxu3  ;;  %1230 = vmatmul.bf16.gmra.mxu2 %v999_v60  ;;  %1328 = vmatmul.bf16.gmra.mxu0 %v999_v60  ;;  %v795_v5 = vadd.f32 %v794_v61, %v2624_v27 }
 0x166   : > { %v894_v63 = vpop.f32.mrf.mxu0 }
 0x167   : > { %v895_v3 = vadd.f32 %v894_v63, %v2621_v23  ;;  %v943_v4 = vpop.f32.mrf.mxu1  ;;  %v844_v10 = vadd.f32 %v843_v62, %v795_v5 }
 0x169   : > { %v944_v6 = vadd.f32 %v943_v4, %v895_v3  ;;  %v977_v19 = vmax.f32 %v844_v10, 0.0 }
 0x16b   : > { %v980_v8 = vmax.f32 %v944_v6, 0.0 }
 0x16c   : > { %v796_v9 = vpop.f32.mrf.mxu2 }
 0x16d   : > { %v1002_v11 = vpack.c.bf16 %v980_v8, %v978_v7  ;;  %v797_v12 = vadd.f32 %v796_v9, %v2624_v27  ;;  %v845_v13 = vpop.f32.mrf.mxu3 }
 0x16e   : > { %v897_v16 = vpop.f32.mrf.mxu0 }
 0x16f   : > { %v846_v17 = vadd.f32 %v845_v13, %v797_v12  ;;  %v946_v18 = vpop.f32.mrf.mxu1  ;;  %1284 = vmatmul.bf16.gmra.mxu3 %v1002_v11  ;;  %1382 = vmatmul.bf16.gmra.mxu1 %v1002_v11  ;;  %v898_v21 = vadd.f32 %v897_v16, %v2621_v23 }
 0x171   : > { %v979_v20 = vmax.f32 %v846_v17, 0.0  ;;  %v947_v25 = vadd.f32 %v946_v18, %v898_v21 }
 0x173   : > { %v1001_v1 = vpack.c.bf16 %v979_v20, %v977_v19  ;;  %v982_v31 = vmax.f32 %v947_v25, 0.0 }
 0x174   : > { %v799_v2 = vpop.f32.mrf.mxu2 }
 0x175   : > { %v848_v22 = vpop.f32.mrf.mxu3  ;;  %1235 = vmatmul.bf16.gmra.mxu2 %v1001_v1  ;;  %1333 = vmatmul.bf16.gmra.mxu0 %v1001_v1  ;;  %v800_v29 = vadd.f32 %v799_v2, %v2624_v27  ;;  %v2189_v2 = vld [vmem:[%s2814_s7] sm:$0xff] }
 0x176   : > { %v899_v24 = vpop.f32.mrf.mxu0  ;;  %1590 = vmatpush.bf16.msra.mxu2 %v2189_v2 }
 0x177   : > { %v900_v26 = vadd.f32 %v899_v24, %v2621_v23  ;;  %v948_v28 = vpop.f32.mrf.mxu1  ;;  %v849_v34 = vadd.f32 %v848_v22, %v800_v29  ;;  %v1041_v29 = vld [vmem:[%s2813_s6] sm:$0x3] }
 0x179   : > { %v949_v30 = vadd.f32 %v948_v28, %v900_v26  ;;  %v981_v43 = vmax.f32 %v849_v34, 0.0 }
 0x17b   : > { %v984_v32 = vmax.f32 %v949_v30, 0.0 }
 0x17c   : > { %v801_v33 = vpop.f32.mrf.mxu2 }
 0x17d   : > { %v1004_v35 = vpack.c.bf16 %v984_v32, %v982_v31  ;;  %v802_v36 = vadd.f32 %v801_v33, %v2624_v27  ;;  %v850_v37 = vpop.f32.mrf.mxu3  ;;  %v2708_v32 = vperm.slane %v1041_v29, 1 }
 0x17e   : > { %v902_v40 = vpop.f32.mrf.mxu0 }
 0x17f   : > { %v851_v41 = vadd.f32 %v850_v37, %v802_v36  ;;  %v951_v42 = vpop.f32.mrf.mxu1  ;;  %1289 = vmatmul.bf16.gmra.mxu3 %v1004_v35  ;;  %1387 = vmatmul.bf16.gmra.mxu1 %v1004_v35  ;;  %v903_v45 = vadd.f32 %v902_v40, %v2621_v23  ;;  %v2711_v36 = vperm.slane %v1041_v29, 0 }
 0x181   : > { %v983_v44 = vmax.f32 %v851_v41, 0.0  ;;  %v952_v52 = vadd.f32 %v951_v42, %v903_v45 }
 0x183   : > { %v1003_v46 = vpack.c.bf16 %v983_v44, %v981_v43  ;;  %v986_v57 = vmax.f32 %v952_v52, 0.0 }
 0x184   : > { %v804_v47 = vpop.f32.mrf.mxu2 }
 0x185   : > { %v853_v48 = vpop.f32.mrf.mxu3  ;;  %1240 = vmatmul.bf16.gmra.mxu2 %v1003_v46  ;;  %1338 = vmatmul.bf16.gmra.mxu0 %v1003_v46  ;;  %v805_v55 = vadd.f32 %v804_v47, %v2624_v27 }
 0x186   : > { %v904_v51 = vpop.f32.mrf.mxu0 }
 0x187   : > { %v905_v53 = vadd.f32 %v904_v51, %v2621_v23  ;;  %v953_v54 = vpop.f32.mrf.mxu1  ;;  %v854_v60 = vadd.f32 %v853_v48, %v805_v55 }
 0x189   : > { %v954_v56 = vadd.f32 %v953_v54, %v905_v53  ;;  %v985_v5 = vmax.f32 %v854_v60, 0.0 }
 0x18b   : > { %v988_v58 = vmax.f32 %v954_v56, 0.0 }
 0x18c   : > { %v806_v59 = vpop.f32.mrf.mxu2 }
 0x18d   : > { %v1006_v61 = vpack.c.bf16 %v988_v58, %v986_v57  ;;  %v807_v62 = vadd.f32 %v806_v59, %v2624_v27  ;;  %v855_v63 = vpop.f32.mrf.mxu3 }
 0x18e   : > { %v907_v0 = vpop.f32.mrf.mxu0 }
 0x18f   : > { %v856_v3 = vadd.f32 %v855_v63, %v807_v62  ;;  %v956_v4 = vpop.f32.mrf.mxu1  ;;  %1294 = vmatmul.bf16.gmra.mxu3 %v1006_v61  ;;  %1392 = vmatmul.bf16.gmra.mxu1 %v1006_v61  ;;  %v908_v7 = vadd.f32 %v907_v0, %v2621_v23 }
 0x191   : > { %v987_v6 = vmax.f32 %v856_v3, 0.0  ;;  %v957_v12 = vadd.f32 %v956_v4, %v908_v7 }
 0x193   : > { %v1005_v8 = vpack.c.bf16 %v987_v6, %v985_v5  ;;  %v990_v17 = vmax.f32 %v957_v12, 0.0 }
 0x194   : > { %v809_v9 = vpop.f32.mrf.mxu2 }
 0x195   : > { %v858_v10 = vpop.f32.mrf.mxu3  ;;  %1245 = vmatmul.bf16.gmra.mxu2 %v1005_v8  ;;  %1343 = vmatmul.bf16.gmra.mxu0 %v1005_v8  ;;  %v810_v15 = vadd.f32 %v809_v9, %v2624_v27 }
 0x196   : > { %v909_v11 = vpop.f32.mrf.mxu0 }
 0x197   : > { %v910_v13 = vadd.f32 %v909_v11, %v2621_v23  ;;  %v958_v14 = vpop.f32.mrf.mxu1  ;;  %v859_v20 = vadd.f32 %v858_v10, %v810_v15  ;;  %v2197_v23 = vld [vmem:[%s2814_s7 + $0x40] sm:$0xff] }
 0x198   : > { %1639 = vmatpush.bf16.msra.mxu3 %v2197_v23 }
 0x199   : > { %v959_v16 = vadd.f32 %v958_v14, %v910_v13  ;;  %v989_v25 = vmax.f32 %v859_v20, 0.0 }
 0x19b   : > { %v992_v18 = vmax.f32 %v959_v16, 0.0 }
 0x19c   : > { %v811_v19 = vpop.f32.mrf.mxu2 }
 0x19d   : > { %v1008_v21 = vpack.c.bf16 %v992_v18, %v990_v17  ;;  %v812_v1 = vadd.f32 %v811_v19, %v2624_v27  ;;  %v860_v22 = vpop.f32.mrf.mxu3 }
 0x19f   : > { %v861_v24 = vadd.f32 %v860_v22, %v812_v1  ;;  %1299 = vmatmul.bf16.gmra.mxu3 %v1008_v21  ;;  %1397 = vmatmul.bf16.gmra.mxu1 %v1008_v21 }
 0x1a1   : > { %v991_v26 = vmax.f32 %v861_v24, 0.0 }
 0x1a3   : > { %v1007_v28 = vpack.c.bf16 %v991_v26, %v989_v25 }
 0x1a5   : > { %1250 = vmatmul.bf16.gmra.mxu2 %v1007_v28  ;;  %1348 = vmatmul.bf16.gmra.mxu0 %v1007_v28 }
 0x1ac   : > { %v1363_v27 = vpop.f32.mrf.mxu1 }
 0x1b2   : > { %v1265_v30 = vpop.f32.mrf.mxu3  ;;  %v1314_v31 = vpop.f32.mrf.mxu0 }
 0x1b3   : > { %v1315_v34 = vadd.f32 %v1314_v31, %v2708_v32 }
 0x1b4   : > { %v1365_v33 = vpop.f32.mrf.mxu1 }
 0x1b5   : > { %v1364_v39 = vadd.f32 %v1363_v27, %v1315_v34 }
 0x1b7   : > { %v1404_v44 = vmax.f32 %v1364_v39, 0.0 }
 0x1b8   : > { %v1216_v35 = vpop.f32.mrf.mxu2 }
 0x1b9   : > { %v1217_v42 = vadd.f32 %v1216_v35, %v2711_v36 }
 0x1ba   : > { %v1267_v37 = vpop.f32.mrf.mxu3  ;;  %v1316_v38 = vpop.f32.mrf.mxu0 }
 0x1bb   : > { %v1317_v40 = vadd.f32 %v1316_v38, %v2708_v32  ;;  %v1266_v47 = vadd.f32 %v1265_v30, %v1217_v42 }
 0x1bc   : > { %v1368_v41 = vpop.f32.mrf.mxu1 }
 0x1bd   : > { %v1366_v43 = vadd.f32 %v1365_v33, %v1317_v40  ;;  %v1403_v54 = vmax.f32 %v1266_v47, 0.0 }
 0x1bf   : > { %v1406_v45 = vmax.f32 %v1366_v43, 0.0 }
 0x1c0   : > { %v1218_v46 = vpop.f32.mrf.mxu2 }
 0x1c1   : > { %v1436_v48 = vpack.c.bf16 %v1406_v45, %v1404_v44  ;;  %v1219_v49 = vadd.f32 %v1218_v46, %v2711_v36 }
 0x1c2   : > { %v1270_v50 = vpop.f32.mrf.mxu3  ;;  %v1319_v51 = vpop.f32.mrf.mxu0 }
 0x1c3   : > { %v1268_v52 = vadd.f32 %v1267_v37, %v1219_v49  ;;  %1640 = vmatmul.bf16.vlgmr.msra.gmra.mxu3 %v1436_v48  ;;  %v1320_v57 = vadd.f32 %v1319_v51, %v2708_v32 }
 0x1c4   : > { %v1370_v53 = vpop.f32.mrf.mxu1 }
 0x1c5   : > { %v1405_v55 = vmax.f32 %v1268_v52, 0.0  ;;  %v1369_v61 = vadd.f32 %v1368_v41, %v1320_v57 }
 0x1c7   : > { %v1435_v56 = vpack.c.bf16 %v1405_v55, %v1403_v54  ;;  %v1408_v4 = vmax.f32 %v1369_v61, 0.0 }
 0x1c8   : > { %v1221_v58 = vpop.f32.mrf.mxu2 }
 0x1c9   : > { %1591 = vmatmul.bf16.vlgmr.msra.gmra.mxu2 %v1435_v56  ;;  %v1222_v0 = vadd.f32 %v1221_v58, %v2711_v36 }
 0x1ca   : > { %v1272_v59 = vpop.f32.mrf.mxu3  ;;  %v1321_v60 = vpop.f32.mrf.mxu0 }
 0x1cb   : > { %v1322_v62 = vadd.f32 %v1321_v60, %v2708_v32  ;;  %v1271_v7 = vadd.f32 %v1270_v50, %v1222_v0 }
 0x1cc   : > { %v1373_v63 = vpop.f32.mrf.mxu1 }
 0x1cd   : > { %v1371_v3 = vadd.f32 %v1370_v53, %v1322_v62  ;;  %v1407_v14 = vmax.f32 %v1271_v7, 0.0 }
 0x1cf   : > { %v1410_v5 = vmax.f32 %v1371_v3, 0.0 }
 0x1d0   : > { %v1223_v6 = vpop.f32.mrf.mxu2 }
 0x1d1   : > { %v1224_v8 = vadd.f32 %v1223_v6, %v2711_v36  ;;  %v1438_v9 = vpack.c.bf16 %v1410_v5, %v1408_v4 }
 0x1d2   : > { %v1275_v10 = vpop.f32.mrf.mxu3  ;;  %v1324_v11 = vpop.f32.mrf.mxu0 }
 0x1d3   : > { %v1273_v12 = vadd.f32 %v1272_v59, %v1224_v8  ;;  %1645 = vmatmul.bf16.gmra.mxu3 %v1438_v9  ;;  %v1325_v16 = vadd.f32 %v1324_v11, %v2708_v32 }
 0x1d4   : > { %v1375_v13 = vpop.f32.mrf.mxu1 }
 0x1d5   : > { %v1409_v15 = vmax.f32 %v1273_v12, 0.0  ;;  %v1374_v21 = vadd.f32 %v1373_v63, %v1325_v16 }
 0x1d7   : > { %v1437_v17 = vpack.c.bf16 %v1409_v15, %v1407_v14  ;;  %v1412_v23 = vmax.f32 %v1374_v21, 0.0 }
 0x1d8   : > { %v1226_v18 = vpop.f32.mrf.mxu2 }
 0x1d9   : > { %1596 = vmatmul.bf16.gmra.mxu2 %v1437_v17  ;;  %v1227_v22 = vadd.f32 %v1226_v18, %v2711_v36 }
 0x1da   : > { %v1277_v19 = vpop.f32.mrf.mxu3  ;;  %v1326_v20 = vpop.f32.mrf.mxu0 }
 0x1db   : > { %v1327_v1 = vadd.f32 %v1326_v20, %v2708_v32  ;;  %v1276_v28 = vadd.f32 %v1275_v10, %v1227_v22 }
 0x1dc   : > { %v1378_v2 = vpop.f32.mrf.mxu1 }
 0x1dd   : > { %v1376_v24 = vadd.f32 %v1375_v13, %v1327_v1  ;;  %v1411_v35 = vmax.f32 %v1276_v28, 0.0 }
 0x1df   : > { %v1414_v25 = vmax.f32 %v1376_v24, 0.0 }
 0x1e0   : > { %v1228_v26 = vpop.f32.mrf.mxu2 }
 0x1e1   : > { %v1229_v27 = vadd.f32 %v1228_v26, %v2711_v36  ;;  %v1440_v29 = vpack.c.bf16 %v1414_v25, %v1412_v23 }
 0x1e2   : > { %v1280_v30 = vpop.f32.mrf.mxu3  ;;  %v1329_v31 = vpop.f32.mrf.mxu0 }
 0x1e3   : > { %v1278_v33 = vadd.f32 %v1277_v19, %v1229_v27  ;;  %1650 = vmatmul.bf16.gmra.mxu3 %v1440_v29  ;;  %v1330_v38 = vadd.f32 %v1329_v31, %v2708_v32 }
 0x1e4   : > { %v1380_v34 = vpop.f32.mrf.mxu1 }
 0x1e5   : > { %v1413_v37 = vmax.f32 %v1278_v33, 0.0  ;;  %v1379_v43 = vadd.f32 %v1378_v2, %v1330_v38 }
 0x1e7   : > { %v1439_v39 = vpack.c.bf16 %v1413_v37, %v1411_v35  ;;  %v1416_v48 = vmax.f32 %v1379_v43, 0.0 }
 0x1e8   : > { %v1231_v40 = vpop.f32.mrf.mxu2 }
 0x1e9   : > { %1601 = vmatmul.bf16.gmra.mxu2 %v1439_v39  ;;  %v1232_v46 = vadd.f32 %v1231_v40, %v2711_v36 }
 0x1ea   : > { %v1282_v41 = vpop.f32.mrf.mxu3  ;;  %v1331_v42 = vpop.f32.mrf.mxu0 }
 0x1eb   : > { %v1332_v44 = vadd.f32 %v1331_v42, %v2708_v32  ;;  %v1281_v51 = vadd.f32 %v1280_v30, %v1232_v46 }
 0x1ec   : > { %v1383_v45 = vpop.f32.mrf.mxu1 }
 0x1ed   : > { %v1381_v47 = vadd.f32 %v1380_v34, %v1332_v44  ;;  %v1415_v58 = vmax.f32 %v1281_v51, 0.0 }
 0x1ef   : > { %v1418_v49 = vmax.f32 %v1381_v47, 0.0 }
 0x1f0   : > { %v1233_v50 = vpop.f32.mrf.mxu2 }
 0x1f1   : > { %v1234_v52 = vadd.f32 %v1233_v50, %v2711_v36  ;;  %v1442_v53 = vpack.c.bf16 %v1418_v49, %v1416_v48 }
 0x1f2   : > { %v1285_v54 = vpop.f32.mrf.mxu3  ;;  %v1334_v55 = vpop.f32.mrf.mxu0 }
 0x1f3   : > { %v1283_v56 = vadd.f32 %v1282_v41, %v1234_v52  ;;  %1655 = vmatmul.bf16.gmra.mxu3 %v1442_v53  ;;  %v1335_v60 = vadd.f32 %v1334_v55, %v2708_v32 }
 0x1f4   : > { %v1385_v57 = vpop.f32.mrf.mxu1 }
 0x1f5   : > { %v1417_v59 = vmax.f32 %v1283_v56, 0.0  ;;  %v1384_v3 = vadd.f32 %v1383_v45, %v1335_v60 }
 0x1f7   : > { %v1441_v61 = vpack.c.bf16 %v1417_v59, %v1415_v58  ;;  %v1420_v8 = vmax.f32 %v1384_v3, 0.0 }
 0x1f8   : > { %v1236_v62 = vpop.f32.mrf.mxu2 }
 0x1f9   : > { %1606 = vmatmul.bf16.gmra.mxu2 %v1441_v61  ;;  %v1237_v6 = vadd.f32 %v1236_v62, %v2711_v36 }
 0x1fa   : > { %v1287_v63 = vpop.f32.mrf.mxu3  ;;  %v1336_v0 = vpop.f32.mrf.mxu0 }
 0x1fb   : > { %v1337_v4 = vadd.f32 %v1336_v0, %v2708_v32  ;;  %v1286_v11 = vadd.f32 %v1285_v54, %v1237_v6 }
 0x1fc   : > { %v1388_v5 = vpop.f32.mrf.mxu1 }
 0x1fd   : > { %v1386_v7 = vadd.f32 %v1385_v57, %v1337_v4  ;;  %v1419_v18 = vmax.f32 %v1286_v11, 0.0 }
 0x1ff   : > { %v1422_v9 = vmax.f32 %v1386_v7, 0.0 }
 0x200   : > { %v1238_v10 = vpop.f32.mrf.mxu2 }
 0x201   : > { %v1239_v12 = vadd.f32 %v1238_v10, %v2711_v36  ;;  %v1444_v13 = vpack.c.bf16 %v1422_v9, %v1420_v8 }
 0x202   : > { %v1290_v14 = vpop.f32.mrf.mxu3  ;;  %v1339_v15 = vpop.f32.mrf.mxu0 }
 0x203   : > { %v1288_v16 = vadd.f32 %v1287_v63, %v1239_v12  ;;  %1660 = vmatmul.bf16.gmra.mxu3 %v1444_v13  ;;  %v1340_v20 = vadd.f32 %v1339_v15, %v2708_v32 }
 0x204   : > { %v1390_v17 = vpop.f32.mrf.mxu1 }
 0x205   : > { %v1421_v19 = vmax.f32 %v1288_v16, 0.0  ;;  %v1389_v24 = vadd.f32 %v1388_v5, %v1340_v20 }
 0x207   : > { %v1443_v21 = vpack.c.bf16 %v1421_v19, %v1419_v18  ;;  %v1424_v27 = vmax.f32 %v1389_v24, 0.0 }
 0x208   : > { %v1241_v1 = vpop.f32.mrf.mxu2 }
 0x209   : > { %1611 = vmatmul.bf16.gmra.mxu2 %v1443_v21  ;;  %v1242_v25 = vadd.f32 %v1241_v1, %v2711_v36  ;;  %v2747_v21 = vld [vmem:[%s2815_s8] ss:$0 sm:$0xff] }
 0x20a   : > { %v1292_v2 = vpop.f32.mrf.mxu3  ;;  %v1341_v22 = vpop.f32.mrf.mxu0 }
 0x20b   : > { %v1342_v23 = vadd.f32 %v1341_v22, %v2708_v32  ;;  %v1291_v31 = vadd.f32 %v1290_v14, %v1242_v25 }
 0x20c   : > { %v1393_v28 = vpop.f32.mrf.mxu1 }
 0x20d   : > { %v1391_v26 = vadd.f32 %v1390_v17, %v1342_v23  ;;  %v1423_v39 = vmax.f32 %v1291_v31, 0.0 }
 0x20f   : > { %v1426_v29 = vmax.f32 %v1391_v26, 0.0 }
 0x210   : > { %v1243_v30 = vpop.f32.mrf.mxu2 }
 0x211   : > { %v1244_v33 = vadd.f32 %v1243_v30, %v2711_v36  ;;  %v1446_v34 = vpack.c.bf16 %v1426_v29, %v1424_v27 }
 0x212   : > { %v1344_v35 = vpop.f32.mrf.mxu0  ;;  %v1295_v38 = vpop.f32.mrf.mxu3 }
 0x213   : > { %v1293_v37 = vadd.f32 %v1292_v2, %v1244_v33  ;;  %1665 = vmatmul.bf16.gmra.mxu3 %v1446_v34  ;;  %v1345_v41 = vadd.f32 %v1344_v35, %v2708_v32 }
 0x214   : > { %v1395_v43 = vpop.f32.mrf.mxu1 }
 0x215   : > { %v1425_v40 = vmax.f32 %v1293_v37, 0.0  ;;  %v1394_v46 = vadd.f32 %v1393_v28, %v1345_v41 }
 0x217   : > { %v1445_v42 = vpack.c.bf16 %v1425_v40, %v1423_v39  ;;  %v1428_v51 = vmax.f32 %v1394_v46, 0.0 }
 0x218   : > { %v1246_v44 = vpop.f32.mrf.mxu2 }
 0x219   : > { %1616 = vmatmul.bf16.gmra.mxu2 %v1445_v42  ;;  %v1247_v48 = vadd.f32 %v1246_v44, %v2711_v36 }
 0x21a   : > { %v1346_v45 = vpop.f32.mrf.mxu0  ;;  %v1297_v50 = vpop.f32.mrf.mxu3 }
 0x21b   : > { %v1347_v47 = vadd.f32 %v1346_v45, %v2708_v32  ;;  %v1296_v54 = vadd.f32 %v1295_v38, %v1247_v48 }
 0x21c   : > { %v1398_v57 = vpop.f32.mrf.mxu1 }
 0x21d   : > { %v1396_v49 = vadd.f32 %v1395_v43, %v1347_v47  ;;  %v1427_v60 = vmax.f32 %v1296_v54, 0.0 }
 0x21f   : > { %v1430_v52 = vmax.f32 %v1396_v49, 0.0 }
 0x220   : > { %v1248_v53 = vpop.f32.mrf.mxu2 }
 0x221   : > { %v1249_v55 = vadd.f32 %v1248_v53, %v2711_v36  ;;  %v1448_v56 = vpack.c.bf16 %v1430_v52, %v1428_v51 }
 0x222   : > { %v1349_v58 = vpop.f32.mrf.mxu0  ;;  %v1300_v0 = vpop.f32.mrf.mxu3 }
 0x223   : > { %v1298_v59 = vadd.f32 %v1297_v50, %v1249_v55  ;;  %1670 = vmatmul.bf16.gmra.mxu3 %v1448_v56  ;;  %v1350_v62 = vadd.f32 %v1349_v58, %v2708_v32 }
 0x224   : > { %v1400_v7 = vpop.f32.mrf.mxu1 }
 0x225   : > { %v1429_v61 = vmax.f32 %v1298_v59, 0.0  ;;  %v1399_v5 = vadd.f32 %v1398_v57, %v1350_v62 }
 0x227   : > { %v1447_v63 = vpack.c.bf16 %v1429_v61, %v1427_v60  ;;  %v1432_v10 = vmax.f32 %v1399_v5, 0.0 }
 0x228   : > { %v1251_v3 = vpop.f32.mrf.mxu2 }
 0x229   : > { %1621 = vmatmul.bf16.gmra.mxu2 %v1447_v63  ;;  %v1252_v8 = vadd.f32 %v1251_v3, %v2711_v36 }
 0x22a   : > { %v1351_v4 = vpop.f32.mrf.mxu0  ;;  %v1302_v16 = vpop.f32.mrf.mxu3 }
 0x22b   : > { %v1352_v6 = vadd.f32 %v1351_v4, %v2708_v32  ;;  %v1301_v13 = vadd.f32 %v1300_v0, %v1252_v8 }
 0x22d   : > { %v1401_v9 = vadd.f32 %v1400_v7, %v1352_v6  ;;  %v1431_v18 = vmax.f32 %v1301_v13, 0.0 }
 0x22f   : > { %v1434_v11 = vmax.f32 %v1401_v9, 0.0 }
 0x230   : > { %v1253_v12 = vpop.f32.mrf.mxu2 }
 0x231   : > { %v1254_v14 = vadd.f32 %v1253_v12, %v2711_v36  ;;  %v1450_v15 = vpack.c.bf16 %v1434_v11, %v1432_v10 }
 0x233   : > { %v1303_v17 = vadd.f32 %v1302_v16, %v1254_v14  ;;  %1675 = vmatmul.bf16.gmra.mxu3 %v1450_v15 }
 0x235   : > { %v1433_v19 = vmax.f32 %v1303_v17, 0.0 }
 0x237   : > { %v1449_v20 = vpack.c.bf16 %v1433_v19, %v1431_v18 }
 0x239   : > { %1626 = vmatmul.bf16.gmra.mxu2 %v1449_v20 }
 0x246   : > { %v1641_v32 = vpop.f32.mrf.mxu3 }
 0x24c   : > { %v1592_v1 = vpop.f32.mrf.mxu2 }
 0x24d   : > { %v1593_v2 = vadd.f32 %v2747_v21, %v1592_v1 }
 0x24e   : > { %v1643_v36 = vpop.f32.mrf.mxu3 }
 0x24f   : > { %v1642_v22 = vadd.f32 %v1641_v32, %v1593_v2 }
 0x251   : > { %1682 = vst.msk [vmem:[%s2755_s28] sm:$0xff] %vm1681_vm1, %v1642_v22 }
 0x254   : > { %v1594_v24 = vpop.f32.mrf.mxu2 }
 0x255   : > { %v1595_v23 = vadd.f32 %v2747_v21, %v1594_v24 }
 0x256   : > { %v1646_v25 = vpop.f32.mrf.mxu3 }
 0x257   : > { %v1644_v26 = vadd.f32 %v1643_v36, %v1595_v23 }
 0x259   : > { %1683 = vst.msk [vmem:[%s2755_s28 + $0x8] sm:$0xff] %vm1681_vm1, %v1644_v26 }
 0x25c   : > { %v1597_v28 = vpop.f32.mrf.mxu2 }
 0x25d   : > { %v1598_v27 = vadd.f32 %v2747_v21, %v1597_v28 }
 0x25e   : > { %v1648_v29 = vpop.f32.mrf.mxu3 }
 0x25f   : > { %v1647_v30 = vadd.f32 %v1646_v25, %v1598_v27 }
 0x261   : > { %1684 = vst.msk [vmem:[%s2755_s28 + $0x10] sm:$0xff] %vm1681_vm1, %v1647_v30 }
 0x264   : > { %v1599_v31 = vpop.f32.mrf.mxu2 }
 0x265   : > { %v1600_v33 = vadd.f32 %v2747_v21, %v1599_v31 }
 0x266   : > { %v1651_v34 = vpop.f32.mrf.mxu3 }
 0x267   : > { %v1649_v35 = vadd.f32 %v1648_v29, %v1600_v33 }
 0x269   : > { %1685 = vst.msk [vmem:[%s2755_s28 + $0x18] sm:$0xff] %vm1681_vm1, %v1649_v35 }
 0x26c   : > { %v1602_v37 = vpop.f32.mrf.mxu2 }
 0x26d   : > { %v1603_v38 = vadd.f32 %v2747_v21, %v1602_v37 }
 0x26e   : > { %v1653_v39 = vpop.f32.mrf.mxu3 }
 0x26f   : > { %v1652_v40 = vadd.f32 %v1651_v34, %v1603_v38 }
 0x271   : > { %1686 = vst.msk [vmem:[%s2755_s28 + $0x20] sm:$0xff] %vm1681_vm1, %v1652_v40 }
 0x274   : > { %v1604_v41 = vpop.f32.mrf.mxu2 }
 0x275   : > { %v1605_v42 = vadd.f32 %v2747_v21, %v1604_v41 }
 0x276   : > { %v1656_v43 = vpop.f32.mrf.mxu3 }
 0x277   : > { %v1654_v44 = vadd.f32 %v1653_v39, %v1605_v42 }
 0x279   : > { %1687 = vst.msk [vmem:[%s2755_s28 + $0x28] sm:$0xff] %vm1681_vm1, %v1654_v44 }
 0x27c   : > { %v1607_v45 = vpop.f32.mrf.mxu2 }
 0x27d   : > { %v1608_v46 = vadd.f32 %v2747_v21, %v1607_v45 }
 0x27e   : > { %v1658_v47 = vpop.f32.mrf.mxu3 }
 0x27f   : > { %v1657_v48 = vadd.f32 %v1656_v43, %v1608_v46 }
 0x281   : > { %1688 = vst.msk [vmem:[%s2755_s28 + $0x30] sm:$0xff] %vm1681_vm1, %v1657_v48 }
 0x284   : > { %v1609_v49 = vpop.f32.mrf.mxu2 }
 0x285   : > { %v1610_v50 = vadd.f32 %v2747_v21, %v1609_v49 }
 0x286   : > { %v1661_v51 = vpop.f32.mrf.mxu3 }
 0x287   : > { %v1659_v52 = vadd.f32 %v1658_v47, %v1610_v50 }
 0x289   : > { %1689 = vst.msk [vmem:[%s2755_s28 + $0x38] sm:$0xff] %vm1681_vm1, %v1659_v52 }
 0x28c   : > { %v1612_v53 = vpop.f32.mrf.mxu2 }
 0x28d   : > { %v1613_v54 = vadd.f32 %v2747_v21, %v1612_v53 }
 0x28e   : > { %v1663_v55 = vpop.f32.mrf.mxu3 }
 0x28f   : > { %v1662_v56 = vadd.f32 %v1661_v51, %v1613_v54 }
 0x291   : > { %1690 = vst.msk [vmem:[%s2755_s28 + $0x40] sm:$0xff] %vm1681_vm1, %v1662_v56 }
 0x294   : > { %v1614_v57 = vpop.f32.mrf.mxu2 }
 0x295   : > { %v1615_v58 = vadd.f32 %v2747_v21, %v1614_v57 }
 0x296   : > { %v1666_v59 = vpop.f32.mrf.mxu3 }
 0x297   : > { %v1664_v60 = vadd.f32 %v1663_v55, %v1615_v58 }
 0x299   : > { %1691 = vst.msk [vmem:[%s2755_s28 + $0x48] sm:$0xff] %vm1681_vm1, %v1664_v60 }
 0x29c   : > { %v1617_v61 = vpop.f32.mrf.mxu2 }
 0x29d   : > { %v1618_v62 = vadd.f32 %v2747_v21, %v1617_v61 }
 0x29e   : > { %v1668_v63 = vpop.f32.mrf.mxu3 }
 0x29f   : > { %v1667_v0 = vadd.f32 %v1666_v59, %v1618_v62 }
 0x2a1   : > { %1692 = vst.msk [vmem:[%s2755_s28 + $0x50] sm:$0xff] %vm1681_vm1, %v1667_v0 }
 0x2a4   : > { %v1619_v3 = vpop.f32.mrf.mxu2 }
 0x2a5   : > { %v1620_v4 = vadd.f32 %v2747_v21, %v1619_v3 }
 0x2a6   : > { %v1671_v6 = vpop.f32.mrf.mxu3 }
 0x2a7   : > { %v1669_v5 = vadd.f32 %v1668_v63, %v1620_v4 }
 0x2a9   : > { %1693 = vst.msk [vmem:[%s2755_s28 + $0x58] sm:$0xff] %vm1681_vm1, %v1669_v5 }
 0x2ac   : > { %v1622_v7 = vpop.f32.mrf.mxu2 }
 0x2ad   : > { %v1623_v8 = vadd.f32 %v2747_v21, %v1622_v7 }
 0x2ae   : > { %v1673_v10 = vpop.f32.mrf.mxu3 }
 0x2af   : > { %v1672_v9 = vadd.f32 %v1671_v6, %v1623_v8 }
 0x2b1   : > { %1694 = vst.msk [vmem:[%s2755_s28 + $0x60] sm:$0xff] %vm1681_vm1, %v1672_v9 }
 0x2b4   : > { %v1624_v11 = vpop.f32.mrf.mxu2 }
 0x2b5   : > { %v1625_v12 = vadd.f32 %v2747_v21, %v1624_v11 }
 0x2b6   : > { %v1676_v14 = vpop.f32.mrf.mxu3 }
 0x2b7   : > { %v1674_v13 = vadd.f32 %v1673_v10, %v1625_v12 }
 0x2b9   : > { %1695 = vst.msk [vmem:[%s2755_s28 + $0x68] sm:$0xff] %vm1681_vm1, %v1674_v13 }
 0x2bc   : > { %v1627_v15 = vpop.f32.mrf.mxu2 }
 0x2bd   : > { %v1628_v16 = vadd.f32 %v2747_v21, %v1627_v15 }
 0x2be   : > { %v1678_v20 = vpop.f32.mrf.mxu3 }
 0x2bf   : > { %v1677_v17 = vadd.f32 %v1676_v14, %v1628_v16 }
 0x2c1   : > { %1696 = vst.msk [vmem:[%s2755_s28 + $0x70] sm:$0xff] %vm1681_vm1, %v1677_v17 }
 0x2c4   : > { %v1629_v18 = vpop.f32.mrf.mxu2 }
 0x2c5   : > { %v1630_v19 = vadd.f32 %v2747_v21, %v1629_v18 }
 0x2c7   : > { %v1679_v32 = vadd.f32 %v1678_v20, %v1630_v19 }
 0x2c9   : > { %1697 = vst.msk [vmem:[%s2755_s28 + $0x78] sm:$0xff] %vm1681_vm1, %v1679_v32 }
 0x2ca PF: > { %s20_s30 = sadd.s32 1, %s2267_s30  }
 0x2cb   : > { %p17_p7 = scmp.ge.s32.totalorder %s20_s30, 4  }
 0x2cd   :  { %19 = sbr.rel (!%p17_p7) target bundleno = 1 (0x1), region = 91 }
 0x2d2   :  { %1720 = vsyncpa [#allocation3], 1 }
 0x2d3   :  { %1722 = vsyncpa [#allocation3 + $0x1], 1 }

</bundles_post_ra>
